<compile_context>
chip_gen: v6e
topology: v6e:2x2x1
jax: 0.10.0
libtpu: 0.0.40
codegen_flags: <defaults>
</compile_context>

<pallas_src>
import math
import functools

import jax
import jax.numpy as jnp
from jax.experimental import pallas as pl
from jax.experimental.pallas import tpu as pltpu


def _round_up(x, m):
    return ((x + m - 1) // m) * m


# ---------------------------------------------------------------------------
# Kernel 1: fused LayerNorm -> Linear (+bias) [-> GELU]
# ---------------------------------------------------------------------------
def _ln_matmul_kernel(x_ref, g_ref, b_ref, w_ref, bias_ref, o_ref, *, eps, apply_gelu):
    x = x_ref[...].astype(jnp.float32)                       # (TM, K)
    mu = jnp.mean(x, axis=-1, keepdims=True)
    xc = x - mu
    var = jnp.mean(xc * xc, axis=-1, keepdims=True)          # biased var, like nn.LayerNorm
    xn = xc * jax.lax.rsqrt(var + eps)
    y = xn * g_ref[...] + b_ref[...]                         # (TM, K)
    out = jnp.dot(y, w_ref[...], preferred_element_type=jnp.float32) + bias_ref[...]
    if apply_gelu:
        c = 0.7978845608028654  # sqrt(2/pi); one tanh per element on the EUP
        out = 0.5 * out * (1.0 + jnp.tanh(c * (out + 0.044715 * out * out * out)))
    o_ref[...] = out.astype(o_ref.dtype)


def ln_matmul(x2d, gamma, beta, w, bias, *, apply_gelu, eps=1e-5, row_tile=1024):
    rows, K = x2d.shape
    N = w.shape[1]
    tile = min(row_tile, _round_up(rows, 8))
    padded = _round_up(rows, tile)
    if padded != rows:
        x2d = jnp.pad(x2d, ((0, padded - rows), (0, 0)))

    cost = pl.CostEstimate(
        flops=int(2 * padded * K * N + 10 * padded * K),
        transcendentals=int(padded * N) if apply_gelu else 0,
        bytes_accessed=int(4 * (padded * K + K * N + 2 * K + N + padded * N)),
    )
    out = pl.pallas_call(
        functools.partial(_ln_matmul_kernel, eps=eps, apply_gelu=apply_gelu),
        out_shape=jax.ShapeDtypeStruct((padded, N), x2d.dtype),
        grid_spec=pltpu.PrefetchScalarGridSpec(
            num_scalar_prefetch=0,
            grid=(padded // tile,),
            in_specs=[
                pl.BlockSpec((tile, K), lambda i: (i, 0)),
                pl.BlockSpec((1, K), lambda i: (0, 0)),
                pl.BlockSpec((1, K), lambda i: (0, 0)),
                pl.BlockSpec((K, N), lambda i: (0, 0)),
                pl.BlockSpec((1, N), lambda i: (0, 0)),
            ],
            out_specs=pl.BlockSpec((tile, N), lambda i: (i, 0)),
        ),
        compiler_params=pltpu.CompilerParams(dimension_semantics=("parallel",)),
        cost_estimate=cost,
    )(x2d, gamma.reshape(1, K), beta.reshape(1, K), w, bias.reshape(1, N))
    return out[:rows]


# ---------------------------------------------------------------------------
# Kernel 2: Linear + bias + residual add (to_out projection / FF2)
# ---------------------------------------------------------------------------
def _matmul_bias_res_kernel(x_ref, w_ref, bias_ref, res_ref, o_ref):
    out = jnp.dot(x_ref[...], w_ref[...], preferred_element_type=jnp.float32)
    o_ref[...] = (out + bias_ref[...] + res_ref[...]).astype(o_ref.dtype)


def matmul_bias_residual(x2d, w, bias, res2d, *, row_tile=1024):
    rows, K = x2d.shape
    N = w.shape[1]
    tile = min(row_tile, _round_up(rows, 8))
    padded = _round_up(rows, tile)
    if padded != rows:
        pad = ((0, padded - rows), (0, 0))
        x2d = jnp.pad(x2d, pad)
        res2d = jnp.pad(res2d, pad)

    cost = pl.CostEstimate(
        flops=int(2 * padded * K * N + 2 * padded * N),
        transcendentals=0,
        bytes_accessed=int(4 * (padded * K + K * N + N + 2 * padded * N)),
    )
    out = pl.pallas_call(
        _matmul_bias_res_kernel,
        out_shape=jax.ShapeDtypeStruct((padded, N), x2d.dtype),
        grid_spec=pltpu.PrefetchScalarGridSpec(
            num_scalar_prefetch=0,
            grid=(padded // tile,),
            in_specs=[
                pl.BlockSpec((tile, K), lambda i: (i, 0)),
                pl.BlockSpec((K, N), lambda i: (0, 0)),
                pl.BlockSpec((1, N), lambda i: (0, 0)),
                pl.BlockSpec((tile, N), lambda i: (i, 0)),
            ],
            out_specs=pl.BlockSpec((tile, N), lambda i: (i, 0)),
        ),
        compiler_params=pltpu.CompilerParams(dimension_semantics=("parallel",)),
        cost_estimate=cost,
    )(x2d, w, bias.reshape(1, N), res2d)
    return out[:rows]


# ---------------------------------------------------------------------------
# Kernel 3: multi-head attention — all heads of one batch element per grid step
# ---------------------------------------------------------------------------
def _mha_kernel(q_ref, k_ref, v_ref, o_ref, *, scale):
    q = q_ref[...]                                            # (H, N, dh)
    k = k_ref[...]
    v = v_ref[...]
    dots = jnp.einsum("hqd,hkd->hqk", q, k,
                      preferred_element_type=jnp.float32) * scale
    dots = dots - jnp.max(dots, axis=-1, keepdims=True)       # stable softmax, one exp
    e = jnp.exp(dots)
    attn = e / jnp.sum(e, axis=-1, keepdims=True)
    o_ref[...] = jnp.einsum("hqk,hkd->hqd", attn, v,
                            preferred_element_type=jnp.float32).astype(o_ref.dtype)


def multi_head_attention(q, k, v, *, scale):
    B, H, N, dh = q.shape
    qf = q.reshape(B * H, N, dh)
    kf = k.reshape(B * H, N, dh)
    vf = v.reshape(B * H, N, dh)
    cost = pl.CostEstimate(
        flops=int(4 * B * H * N * N * dh),
        transcendentals=int(B * H * N * N),
        bytes_accessed=int(4 * 4 * B * H * N * dh),
    )
    spec = pl.BlockSpec((H, N, dh), lambda b: (b, 0, 0))
    out = pl.pallas_call(
        functools.partial(_mha_kernel, scale=scale),
        out_shape=jax.ShapeDtypeStruct((B * H, N, dh), q.dtype),
        grid_spec=pltpu.PrefetchScalarGridSpec(
            num_scalar_prefetch=0,
            grid=(B,),
            in_specs=[spec, spec, spec],
            out_specs=spec,
        ),
        compiler_params=pltpu.CompilerParams(dimension_semantics=("parallel",)),
        cost_estimate=cost,
    )(qf, kf, vf)
    return out.reshape(B, H, N, dh)


# ---------------------------------------------------------------------------
# Transformer forward (Pallas composition)
# ---------------------------------------------------------------------------
def transformer_forward(x, params, *, heads, dim_head, row_tile=1024):
    B, N, dim = x.shape
    inner = heads * dim_head
    scale = dim_head ** -0.5
    rows = B * N
    x2d = x.reshape(rows, dim)
    zero_qkv_bias = jnp.zeros((3 * inner,), x.dtype)          # to_qkv has bias=False

    def to_heads(t):
        return t.reshape(B, N, heads, dim_head).transpose(0, 2, 1, 3)  # b n (h d) -> b h n d

    for layer in params["layers"]:
        # ---- x = x + to_out(Attention(LayerNorm(x))) ------------------
        qkv = ln_matmul(x2d, layer["ln1_g"], layer["ln1_b"], layer["w_qkv"],
                        zero_qkv_bias, apply_gelu=False, row_tile=row_tile)
        q, k, v = jnp.split(qkv.reshape(B, N, 3 * inner), 3, axis=-1)
        o = multi_head_attention(to_heads(q), to_heads(k), to_heads(v), scale=scale)
        o2d = o.transpose(0, 2, 1, 3).reshape(rows, inner)    # b h n d -> b n (h d)
        x2d = matmul_bias_residual(o2d, layer["w_out"], layer["b_out"], x2d,
                                   row_tile=row_tile)         # Dropout(0.0) == identity

        # ---- x = x + FF2(GELU(FF1(LayerNorm(x)))) ---------------------
        h = ln_matmul(x2d, layer["ln2_g"], layer["ln2_b"], layer["w_ff1"],
                      layer["b_ff1"], apply_gelu=True, row_tile=row_tile)
        x2d = matmul_bias_residual(h, layer["w_ff2"], layer["b_ff2"], x2d,
                                   row_tile=row_tile)

    return x2d.reshape(B, N, dim)


# ---------------------------------------------------------------------------
# Deterministic parameter construction + pure-JAX reference
# ---------------------------------------------------------------------------
def init_params(key, *, dim, depth, heads, dim_head, mlp_dim):
    inner = heads * dim_head
    layers = []
    for _ in range(depth):
        key, *ks = jax.random.split(key, 12)
        layers.append({
            "ln1_g": 1.0 + 0.05 * jax.random.normal(ks[0], (dim,), jnp.float32),
            "ln1_b": 0.05 * jax.random.normal(ks[1], (dim,), jnp.float32),
            "w_qkv": jax.random.normal(ks[2], (dim, 3 * inner), jnp.float32) / math.sqrt(dim),
            "w_out": jax.random.normal(ks[3], (inner, dim), jnp.float32) / math.sqrt(inner),
            "b_out": 0.05 * jax.random.normal(ks[4], (dim,), jnp.float32),
            "ln2_g": 1.0 + 0.05 * jax.random.normal(ks[5], (dim,), jnp.float32),
            "ln2_b": 0.05 * jax.random.normal(ks[6], (dim,), jnp.float32),
            "w_ff1": jax.random.normal(ks[7], (dim, mlp_dim), jnp.float32) / math.sqrt(dim),
            "b_ff1": 0.05 * jax.random.normal(ks[8], (mlp_dim,), jnp.float32),
            "w_ff2": jax.random.normal(ks[9], (mlp_dim, dim), jnp.float32) / math.sqrt(mlp_dim),
            "b_ff2": 0.05 * jax.random.normal(ks[10], (dim,), jnp.float32),
        })
    return {"layers": layers}


def reference_forward(x, params, *, heads, dim_head, eps=1e-5):
    hp = jax.lax.Precision.HIGHEST
    B, N, dim = x.shape
    inner = heads * dim_head
    scale = dim_head ** -0.5

    def layernorm(v, g, b):
        mu = jnp.mean(v, axis=-1, keepdims=True)
        var = jnp.mean((v - mu) ** 2, axis=-1, keepdims=True)
        return (v - mu) * jax.lax.rsqrt(var + eps) * g + b

    for layer in params["layers"]:
        h = layernorm(x, layer["ln1_g"], layer["ln1_b"])
        qkv = jnp.einsum("bnd,de->bne", h, layer["w_qkv"], precision=hp)
        q, k, v = jnp.split(qkv, 3, axis=-1)
        to_heads = lambda t: t.reshape(B, N, heads, dim_head).transpose(0, 2, 1, 3)
        q, k, v = to_heads(q), to_heads(k), to_heads(v)
        dots = jnp.einsum("bhqd,bhkd->bhqk", q, k, precision=hp) * scale
        attn = jax.nn.softmax(dots, axis=-1)
        o = jnp.einsum("bhqk,bhkd->bhqd", attn, v, precision=hp)
        o = o.transpose(0, 2, 1, 3).reshape(B, N, inner)
        x = jnp.einsum("bne,ed->bnd", o, layer["w_out"], precision=hp) + layer["b_out"] + x
        h = layernorm(x, layer["ln2_g"], layer["ln2_b"])
        h = jnp.einsum("bnd,dm->bnm", h, layer["w_ff1"], precision=hp) + layer["b_ff1"]
        h = jax.nn.gelu(h, approximate=True)
        x = jnp.einsum("bnm,md->bnd", h, layer["w_ff2"], precision=hp) + layer["b_ff2"] + x
    return x


if __name__ == "__main__":
    B, N, dim = 2, 16, 32
    depth, heads, dim_head, mlp_dim = 2, 4, 8, 64

    key = jax.random.PRNGKey(0)
    k_x, k_p = jax.random.split(key)
    x = jax.random.normal(k_x, (B, N, dim), dtype=jnp.float32)
    params = init_params(k_p, dim=dim, depth=depth, heads=heads,
                         dim_head=dim_head, mlp_dim=mlp_dim)

    fwd = jax.jit(functools.partial(transformer_forward, heads=heads, dim_head=dim_head))
    out = jax.block_until_ready(fwd(x, params))

    ref = reference_forward(x, params, heads=heads, dim_head=dim_head)
    assert out.shape == (B, N, dim), out.shape
    max_err = float(jnp.max(jnp.abs(out - ref)))
    assert jnp.allclose(out, ref, atol=1e-3, rtol=1e-3), max_err
    print("KERNEL_OK")
</pallas_src>

<mosaic_0001>
module attributes {stable_mosaic.version = 11 : i64} {
  func.func @_ln_matmul_kernel(%arg0: i32, %arg1: memref<32x32xf32, #tpu.memory_space<vmem>>, %arg2: memref<1x32xf32, #tpu.memory_space<vmem>>, %arg3: memref<1x32xf32, #tpu.memory_space<vmem>>, %arg4: memref<32x96xf32, #tpu.memory_space<vmem>>, %arg5: memref<1x96xf32, #tpu.memory_space<vmem>>, %arg6: memref<32x96xf32, #tpu.memory_space<vmem>>) attributes {dimension_semantics = [#tpu.dimension_semantics<parallel>], iteration_bounds = array<i64: 1>, scalar_prefetch = 0 : i64, scratch_operands = 0 : i64, tpu.core_type = #tpu.core_type<tc>, window_params = [{transform_indices = @transform_0, window_bounds = array<i64: 32, 32>}, {pipeline_mode = #tpu.pipeline_mode<synchronous>, transform_indices = @transform_1, window_bounds = array<i64: 1, 32>}, {pipeline_mode = #tpu.pipeline_mode<synchronous>, transform_indices = @transform_2, window_bounds = array<i64: 1, 32>}, {pipeline_mode = #tpu.pipeline_mode<synchronous>, transform_indices = @transform_3, window_bounds = array<i64: 32, 96>}, {pipeline_mode = #tpu.pipeline_mode<synchronous>, transform_indices = @transform_4, window_bounds = array<i64: 1, 96>}, {transform_indices = @transform_5, window_bounds = array<i64: 32, 96>}]} {
    %c0 = arith.constant 0 : index
    %c0_0 = arith.constant 0 : index
    %0 = vector.load %arg1[%c0, %c0_0] : memref<32x32xf32, #tpu.memory_space<vmem>>, vector<32x32xf32>
    %cst = arith.constant dense<0.000000e+00> : vector<32xf32>
    %1 = vector.multi_reduction <add>, %0, %cst [1] : vector<32x32xf32> to vector<32xf32>
    %2 = vector.shape_cast %1 : vector<32xf32> to vector<32x1xf32>
    %cst_1 = arith.constant 3.200000e+01 : f32
    %3 = vector.broadcast %cst_1 : f32 to vector<32x1xf32>
    %4 = arith.divf %2, %3 : vector<32x1xf32>
    %5 = vector.broadcast %4 : vector<32x1xf32> to vector<32x32xf32>
    %6 = arith.subf %0, %5 : vector<32x32xf32>
    %7 = arith.mulf %6, %6 : vector<32x32xf32>
    %cst_2 = arith.constant dense<0.000000e+00> : vector<32xf32>
    %8 = vector.multi_reduction <add>, %7, %cst_2 [1] : vector<32x32xf32> to vector<32xf32>
    %9 = vector.shape_cast %8 : vector<32xf32> to vector<32x1xf32>
    %cst_3 = arith.constant 3.200000e+01 : f32
    %10 = vector.broadcast %cst_3 : f32 to vector<32x1xf32>
    %11 = arith.divf %9, %10 : vector<32x1xf32>
    %cst_4 = arith.constant 9.99999974E-6 : f32
    %12 = vector.broadcast %cst_4 : f32 to vector<32x1xf32>
    %13 = arith.addf %11, %12 : vector<32x1xf32>
    %14 = math.rsqrt %13 : vector<32x1xf32>
    %15 = vector.broadcast %14 : vector<32x1xf32> to vector<32x32xf32>
    %16 = arith.mulf %6, %15 : vector<32x32xf32>
    %c0_5 = arith.constant 0 : index
    %c0_6 = arith.constant 0 : index
    %17 = vector.load %arg2[%c0_5, %c0_6] : memref<1x32xf32, #tpu.memory_space<vmem>>, vector<1x32xf32>
    %18 = vector.broadcast %17 : vector<1x32xf32> to vector<32x32xf32>
    %19 = arith.mulf %16, %18 : vector<32x32xf32>
    %c0_7 = arith.constant 0 : index
    %c0_8 = arith.constant 0 : index
    %20 = vector.load %arg3[%c0_7, %c0_8] : memref<1x32xf32, #tpu.memory_space<vmem>>, vector<1x32xf32>
    %21 = vector.broadcast %20 : vector<1x32xf32> to vector<32x32xf32>
    %22 = arith.addf %19, %21 : vector<32x32xf32>
    %c0_9 = arith.constant 0 : index
    %c0_10 = arith.constant 0 : index
    %23 = vector.load %arg4[%c0_9, %c0_10] : memref<32x96xf32, #tpu.memory_space<vmem>>, vector<32x96xf32>
    %cst_11 = arith.constant dense<0.000000e+00> : vector<32x96xf32>
    %24 = tpu.matmul %22, %23, %cst_11 {dimension_numbers = #tpu.dot_dimension_numbers<[1], [0], [0], [1], [0, 0, 1, 1], [], []>} : vector<32x32xf32>, vector<32x96xf32>, vector<32x96xf32> -> vector<32x96xf32>
    %c0_12 = arith.constant 0 : index
    %c0_13 = arith.constant 0 : index
    %25 = vector.load %arg5[%c0_12, %c0_13] : memref<1x96xf32, #tpu.memory_space<vmem>>, vector<1x96xf32>
    %26 = vector.broadcast %25 : vector<1x96xf32> to vector<32x96xf32>
    %27 = arith.addf %24, %26 : vector<32x96xf32>
    %c0_14 = arith.constant 0 : index
    %c0_15 = arith.constant 0 : index
    %28 = vector.load %arg6[%c0_14, %c0_15] : memref<32x96xf32, #tpu.memory_space<vmem>>, vector<32x96xf32>
    tpu.vector_store %arg6[%c0_14, %c0_15], %27 {strides = array<i32>} : memref<32x96xf32, #tpu.memory_space<vmem>>, vector<32x96xf32>,
    return
  }
  func.func @transform_0(%arg0: i32) -> (i32, i32) {
    %c0_i32 = arith.constant 0 : i32
    %c0_i32_0 = arith.constant 0 : i32
    return %arg0, %c0_i32 : i32, i32
  }
  func.func @transform_1(%arg0: i32) -> (i32, i32) {
    %c0_i32 = arith.constant 0 : i32
    %c0_i32_0 = arith.constant 0 : i32
    %c0_i32_1 = arith.constant 0 : i32
    return %c0_i32, %c0_i32_0 : i32, i32
  }
  func.func @transform_2(%arg0: i32) -> (i32, i32) {
    %c0_i32 = arith.constant 0 : i32
    %c0_i32_0 = arith.constant 0 : i32
    %c0_i32_1 = arith.constant 0 : i32
    return %c0_i32, %c0_i32_0 : i32, i32
  }
  func.func @transform_3(%arg0: i32) -> (i32, i32) {
    %c0_i32 = arith.constant 0 : i32
    %c0_i32_0 = arith.constant 0 : i32
    %c0_i32_1 = arith.constant 0 : i32
    return %c0_i32, %c0_i32_0 : i32, i32
  }
  func.func @transform_4(%arg0: i32) -> (i32, i32) {
    %c0_i32 = arith.constant 0 : i32
    %c0_i32_0 = arith.constant 0 : i32
    %c0_i32_1 = arith.constant 0 : i32
    return %c0_i32, %c0_i32_0 : i32, i32
  }
  func.func @transform_5(%arg0: i32) -> (i32, i32) {
    %c0_i32 = arith.constant 0 : i32
    %c0_i32_0 = arith.constant 0 : i32
    return %arg0, %c0_i32 : i32, i32
  }
}

module attributes {stable_mosaic.version = 11 : i64} {
  func.func @_mha_kernel(%arg0: i32, %arg1: memref<4x16x8xf32, #tpu.memory_space<vmem>>, %arg2: memref<4x16x8xf32, #tpu.memory_space<vmem>>, %arg3: memref<4x16x8xf32, #tpu.memory_space<vmem>>, %arg4: memref<4x16x8xf32, #tpu.memory_space<vmem>>) attributes {dimension_semantics = [#tpu.dimension_semantics<parallel>], iteration_bounds = array<i64: 2>, scalar_prefetch = 0 : i64, scratch_operands = 0 : i64, tpu.core_type = #tpu.core_type<tc>, window_params = [{transform_indices = @transform_0, window_bounds = array<i64: 4, 16, 8>}, {transform_indices = @transform_1, window_bounds = array<i64: 4, 16, 8>}, {transform_indices = @transform_2, window_bounds = array<i64: 4, 16, 8>}, {transform_indices = @transform_3, window_bounds = array<i64: 4, 16, 8>}]} {
    %c0 = arith.constant 0 : index
    %c0_0 = arith.constant 0 : index
    %c0_1 = arith.constant 0 : index
    %0 = vector.load %arg1[%c0, %c0_0, %c0_1] : memref<4x16x8xf32, #tpu.memory_space<vmem>>, vector<4x16x8xf32>
    %c0_2 = arith.constant 0 : index
    %c0_3 = arith.constant 0 : index
    %c0_4 = arith.constant 0 : index
    %1 = vector.load %arg2[%c0_2, %c0_3, %c0_4] : memref<4x16x8xf32, #tpu.memory_space<vmem>>, vector<4x16x8xf32>
    %c0_5 = arith.constant 0 : index
    %c0_6 = arith.constant 0 : index
    %c0_7 = arith.constant 0 : index
    %2 = vector.load %arg3[%c0_5, %c0_6, %c0_7] : memref<4x16x8xf32, #tpu.memory_space<vmem>>, vector<4x16x8xf32>
    "tpu.trace_start"() <{level = 10 : i32, message = "hqd,hkd->hqk"}> : () -> ()
    %cst = arith.constant dense<0.000000e+00> : vector<4x16x16xf32>
    %3 = tpu.matmul %0, %1, %cst {dimension_numbers = #tpu.dot_dimension_numbers<[2], [2], [1], [1], [0, 0, 0, 1, 1, 1], [0], [0]>} : vector<4x16x8xf32>, vector<4x16x8xf32>, vector<4x16x16xf32> -> vector<4x16x16xf32>
    "tpu.trace_stop"() : () -> ()
    %cst_8 = arith.constant 0.353553385 : f32
    %4 = vector.broadcast %cst_8 : f32 to vector<4x16x16xf32>
    %5 = arith.mulf %3, %4 : vector<4x16x16xf32>
    %cst_9 = arith.constant dense<0xFF800000> : vector<4x16xf32>
    %6 = vector.multi_reduction <maximumf>, %5, %cst_9 [2] : vector<4x16x16xf32> to vector<4x16xf32>
    %7 = vector.shape_cast %6 : vector<4x16xf32> to vector<4x16x1xf32>
    %8 = vector.broadcast %7 : vector<4x16x1xf32> to vector<4x16x16xf32>
    %9 = arith.subf %5, %8 : vector<4x16x16xf32>
    %10 = math.exp %9 : vector<4x16x16xf32>
    %cst_10 = arith.constant dense<0.000000e+00> : vector<4x16xf32>
    %11 = vector.multi_reduction <add>, %10, %cst_10 [2] : vector<4x16x16xf32> to vector<4x16xf32>
    %12 = vector.shape_cast %11 : vector<4x16xf32> to vector<4x16x1xf32>
    %13 = vector.broadcast %12 : vector<4x16x1xf32> to vector<4x16x16xf32>
    %14 = arith.divf %10, %13 : vector<4x16x16xf32>
    "tpu.trace_start"() <{level = 10 : i32, message = "hqk,hkd->hqd"}> : () -> ()
    %cst_11 = arith.constant dense<0.000000e+00> : vector<4x16x8xf32>
    %15 = tpu.matmul %14, %2, %cst_11 {dimension_numbers = #tpu.dot_dimension_numbers<[2], [1], [1], [2], [0, 0, 0, 1, 1, 2], [0], [0]>} : vector<4x16x16xf32>, vector<4x16x8xf32>, vector<4x16x8xf32> -> vector<4x16x8xf32>
    "tpu.trace_stop"() : () -> ()
    %c0_12 = arith.constant 0 : index
    %c0_13 = arith.constant 0 : index
    %c0_14 = arith.constant 0 : index
    %16 = vector.load %arg4[%c0_12, %c0_13, %c0_14] : memref<4x16x8xf32, #tpu.memory_space<vmem>>, vector<4x16x8xf32>
    tpu.vector_store %arg4[%c0_12, %c0_13, %c0_14], %15 {strides = array<i32>} : memref<4x16x8xf32, #tpu.memory_space<vmem>>, vector<4x16x8xf32>,
    return
  }
  func.func @transform_0(%arg0: i32) -> (i32, i32, i32) {
    %c0_i32 = arith.constant 0 : i32
    %c0_i32_0 = arith.constant 0 : i32
    %c0_i32_1 = arith.constant 0 : i32
    return %arg0, %c0_i32, %c0_i32_0 : i32, i32, i32
  }
  func.func @transform_1(%arg0: i32) -> (i32, i32, i32) {
    %c0_i32 = arith.constant 0 : i32
    %c0_i32_0 = arith.constant 0 : i32
    %c0_i32_1 = arith.constant 0 : i32
    return %arg0, %c0_i32, %c0_i32_0 : i32, i32, i32
  }
  func.func @transform_2(%arg0: i32) -> (i32, i32, i32) {
    %c0_i32 = arith.constant 0 : i32
    %c0_i32_0 = arith.constant 0 : i32
    %c0_i32_1 = arith.constant 0 : i32
    return %arg0, %c0_i32, %c0_i32_0 : i32, i32, i32
  }
  func.func @transform_3(%arg0: i32) -> (i32, i32, i32) {
    %c0_i32 = arith.constant 0 : i32
    %c0_i32_0 = arith.constant 0 : i32
    %c0_i32_1 = arith.constant 0 : i32
    return %arg0, %c0_i32, %c0_i32_0 : i32, i32, i32
  }
}

module attributes {stable_mosaic.version = 11 : i64} {
  func.func @_matmul_bias_res_kernel(%arg0: i32, %arg1: memref<32x32xf32, #tpu.memory_space<vmem>>, %arg2: memref<32x32xf32, #tpu.memory_space<vmem>>, %arg3: memref<1x32xf32, #tpu.memory_space<vmem>>, %arg4: memref<32x32xf32, #tpu.memory_space<vmem>>, %arg5: memref<32x32xf32, #tpu.memory_space<vmem>>) attributes {dimension_semantics = [#tpu.dimension_semantics<parallel>], iteration_bounds = array<i64: 1>, scalar_prefetch = 0 : i64, scratch_operands = 0 : i64, tpu.core_type = #tpu.core_type<tc>, window_params = [{transform_indices = @transform_0, window_bounds = array<i64: 32, 32>}, {pipeline_mode = #tpu.pipeline_mode<synchronous>, transform_indices = @transform_1, window_bounds = array<i64: 32, 32>}, {pipeline_mode = #tpu.pipeline_mode<synchronous>, transform_indices = @transform_2, window_bounds = array<i64: 1, 32>}, {transform_indices = @transform_3, window_bounds = array<i64: 32, 32>}, {transform_indices = @transform_4, window_bounds = array<i64: 32, 32>}]} {
    %c0 = arith.constant 0 : index
    %c0_0 = arith.constant 0 : index
    %0 = vector.load %arg1[%c0, %c0_0] : memref<32x32xf32, #tpu.memory_space<vmem>>, vector<32x32xf32>
    %c0_1 = arith.constant 0 : index
    %c0_2 = arith.constant 0 : index
    %1 = vector.load %arg2[%c0_1, %c0_2] : memref<32x32xf32, #tpu.memory_space<vmem>>, vector<32x32xf32>
    %cst = arith.constant dense<0.000000e+00> : vector<32x32xf32>
    %2 = tpu.matmul %0, %1, %cst {dimension_numbers = #tpu.dot_dimension_numbers<[1], [0], [0], [1], [0, 0, 1, 1], [], []>} : vector<32x32xf32>, vector<32x32xf32>, vector<32x32xf32> -> vector<32x32xf32>
    %c0_3 = arith.constant 0 : index
    %c0_4 = arith.constant 0 : index
    %3 = vector.load %arg3[%c0_3, %c0_4] : memref<1x32xf32, #tpu.memory_space<vmem>>, vector<1x32xf32>
    %4 = vector.broadcast %3 : vector<1x32xf32> to vector<32x32xf32>
    %5 = arith.addf %2, %4 : vector<32x32xf32>
    %c0_5 = arith.constant 0 : index
    %c0_6 = arith.constant 0 : index
    %6 = vector.load %arg4[%c0_5, %c0_6] : memref<32x32xf32, #tpu.memory_space<vmem>>, vector<32x32xf32>
    %7 = arith.addf %5, %6 : vector<32x32xf32>
    %c0_7 = arith.constant 0 : index
    %c0_8 = arith.constant 0 : index
    %8 = vector.load %arg5[%c0_7, %c0_8] : memref<32x32xf32, #tpu.memory_space<vmem>>, vector<32x32xf32>
    tpu.vector_store %arg5[%c0_7, %c0_8], %7 {strides = array<i32>} : memref<32x32xf32, #tpu.memory_space<vmem>>, vector<32x32xf32>,
    return
  }
  func.func @transform_0(%arg0: i32) -> (i32, i32) {
    %c0_i32 = arith.constant 0 : i32
    %c0_i32_0 = arith.constant 0 : i32
    return %arg0, %c0_i32 : i32, i32
  }
  func.func @transform_1(%arg0: i32) -> (i32, i32) {
    %c0_i32 = arith.constant 0 : i32
    %c0_i32_0 = arith.constant 0 : i32
    %c0_i32_1 = arith.constant 0 : i32
    return %c0_i32, %c0_i32_0 : i32, i32
  }
  func.func @transform_2(%arg0: i32) -> (i32, i32) {
    %c0_i32 = arith.constant 0 : i32
    %c0_i32_0 = arith.constant 0 : i32
    %c0_i32_1 = arith.constant 0 : i32
    return %c0_i32, %c0_i32_0 : i32, i32
  }
  func.func @transform_3(%arg0: i32) -> (i32, i32) {
    %c0_i32 = arith.constant 0 : i32
    %c0_i32_0 = arith.constant 0 : i32
    return %arg0, %c0_i32 : i32, i32
  }
  func.func @transform_4(%arg0: i32) -> (i32, i32) {
    %c0_i32 = arith.constant 0 : i32
    %c0_i32_0 = arith.constant 0 : i32
    return %arg0, %c0_i32 : i32, i32
  }
}

module attributes {stable_mosaic.version = 11 : i64} {
  func.func @_ln_matmul_kernel(%arg0: i32, %arg1: memref<32x32xf32, #tpu.memory_space<vmem>>, %arg2: memref<1x32xf32, #tpu.memory_space<vmem>>, %arg3: memref<1x32xf32, #tpu.memory_space<vmem>>, %arg4: memref<32x64xf32, #tpu.memory_space<vmem>>, %arg5: memref<1x64xf32, #tpu.memory_space<vmem>>, %arg6: memref<32x64xf32, #tpu.memory_space<vmem>>) attributes {dimension_semantics = [#tpu.dimension_semantics<parallel>], iteration_bounds = array<i64: 1>, scalar_prefetch = 0 : i64, scratch_operands = 0 : i64, tpu.core_type = #tpu.core_type<tc>, window_params = [{transform_indices = @transform_0, window_bounds = array<i64: 32, 32>}, {pipeline_mode = #tpu.pipeline_mode<synchronous>, transform_indices = @transform_1, window_bounds = array<i64: 1, 32>}, {pipeline_mode = #tpu.pipeline_mode<synchronous>, transform_indices = @transform_2, window_bounds = array<i64: 1, 32>}, {pipeline_mode = #tpu.pipeline_mode<synchronous>, transform_indices = @transform_3, window_bounds = array<i64: 32, 64>}, {pipeline_mode = #tpu.pipeline_mode<synchronous>, transform_indices = @transform_4, window_bounds = array<i64: 1, 64>}, {transform_indices = @transform_5, window_bounds = array<i64: 32, 64>}]} {
    %c0 = arith.constant 0 : index
    %c0_0 = arith.constant 0 : index
    %0 = vector.load %arg1[%c0, %c0_0] : memref<32x32xf32, #tpu.memory_space<vmem>>, vector<32x32xf32>
    %cst = arith.constant dense<0.000000e+00> : vector<32xf32>
    %1 = vector.multi_reduction <add>, %0, %cst [1] : vector<32x32xf32> to vector<32xf32>
    %2 = vector.shape_cast %1 : vector<32xf32> to vector<32x1xf32>
    %cst_1 = arith.constant 3.200000e+01 : f32
    %3 = vector.broadcast %cst_1 : f32 to vector<32x1xf32>
    %4 = arith.divf %2, %3 : vector<32x1xf32>
    %5 = vector.broadcast %4 : vector<32x1xf32> to vector<32x32xf32>
    %6 = arith.subf %0, %5 : vector<32x32xf32>
    %7 = arith.mulf %6, %6 : vector<32x32xf32>
    %cst_2 = arith.constant dense<0.000000e+00> : vector<32xf32>
    %8 = vector.multi_reduction <add>, %7, %cst_2 [1] : vector<32x32xf32> to vector<32xf32>
    %9 = vector.shape_cast %8 : vector<32xf32> to vector<32x1xf32>
    %cst_3 = arith.constant 3.200000e+01 : f32
    %10 = vector.broadcast %cst_3 : f32 to vector<32x1xf32>
    %11 = arith.divf %9, %10 : vector<32x1xf32>
    %cst_4 = arith.constant 9.99999974E-6 : f32
    %12 = vector.broadcast %cst_4 : f32 to vector<32x1xf32>
    %13 = arith.addf %11, %12 : vector<32x1xf32>
    %14 = math.rsqrt %13 : vector<32x1xf32>
    %15 = vector.broadcast %14 : vector<32x1xf32> to vector<32x32xf32>
    %16 = arith.mulf %6, %15 : vector<32x32xf32>
    %c0_5 = arith.constant 0 : index
    %c0_6 = arith.constant 0 : index
    %17 = vector.load %arg2[%c0_5, %c0_6] : memref<1x32xf32, #tpu.memory_space<vmem>>, vector<1x32xf32>
    %18 = vector.broadcast %17 : vector<1x32xf32> to vector<32x32xf32>
    %19 = arith.mulf %16, %18 : vector<32x32xf32>
    %c0_7 = arith.constant 0 : index
    %c0_8 = arith.constant 0 : index
    %20 = vector.load %arg3[%c0_7, %c0_8] : memref<1x32xf32, #tpu.memory_space<vmem>>, vector<1x32xf32>
    %21 = vector.broadcast %20 : vector<1x32xf32> to vector<32x32xf32>
    %22 = arith.addf %19, %21 : vector<32x32xf32>
    %c0_9 = arith.constant 0 : index
    %c0_10 = arith.constant 0 : index
    %23 = vector.load %arg4[%c0_9, %c0_10] : memref<32x64xf32, #tpu.memory_space<vmem>>, vector<32x64xf32>
    %cst_11 = arith.constant dense<0.000000e+00> : vector<32x64xf32>
    %24 = tpu.matmul %22, %23, %cst_11 {dimension_numbers = #tpu.dot_dimension_numbers<[1], [0], [0], [1], [0, 0, 1, 1], [], []>} : vector<32x32xf32>, vector<32x64xf32>, vector<32x64xf32> -> vector<32x64xf32>
    %c0_12 = arith.constant 0 : index
    %c0_13 = arith.constant 0 : index
    %25 = vector.load %arg5[%c0_12, %c0_13] : memref<1x64xf32, #tpu.memory_space<vmem>>, vector<1x64xf32>
    %26 = vector.broadcast %25 : vector<1x64xf32> to vector<32x64xf32>
    %27 = arith.addf %24, %26 : vector<32x64xf32>
    %cst_14 = arith.constant 5.000000e-01 : f32
    %28 = vector.broadcast %cst_14 : f32 to vector<32x64xf32>
    %29 = arith.mulf %28, %27 : vector<32x64xf32>
    %cst_15 = arith.constant 4.471500e-02 : f32
    %30 = vector.broadcast %cst_15 : f32 to vector<32x64xf32>
    %31 = arith.mulf %30, %27 : vector<32x64xf32>
    %32 = arith.mulf %31, %27 : vector<32x64xf32>
    %33 = arith.mulf %32, %27 : vector<32x64xf32>
    %34 = arith.addf %27, %33 : vector<32x64xf32>
    %cst_16 = arith.constant 0.797884583 : f32
    %35 = vector.broadcast %cst_16 : f32 to vector<32x64xf32>
    %36 = arith.mulf %35, %34 : vector<32x64xf32>
    %37 = math.tanh %36 : vector<32x64xf32>
    %cst_17 = arith.constant 1.000000e+00 : f32
    %38 = vector.broadcast %cst_17 : f32 to vector<32x64xf32>
    %39 = arith.addf %38, %37 : vector<32x64xf32>
    %40 = arith.mulf %29, %39 : vector<32x64xf32>
    %c0_18 = arith.constant 0 : index
    %c0_19 = arith.constant 0 : index
    %41 = vector.load %arg6[%c0_18, %c0_19] : memref<32x64xf32, #tpu.memory_space<vmem>>, vector<32x64xf32>
    tpu.vector_store %arg6[%c0_18, %c0_19], %40 {strides = array<i32>} : memref<32x64xf32, #tpu.memory_space<vmem>>, vector<32x64xf32>,
    return
  }
  func.func @transform_0(%arg0: i32) -> (i32, i32) {
    %c0_i32 = arith.constant 0 : i32
    %c0_i32_0 = arith.constant 0 : i32
    return %arg0, %c0_i32 : i32, i32
  }
  func.func @transform_1(%arg0: i32) -> (i32, i32) {
    %c0_i32 = arith.constant 0 : i32
    %c0_i32_0 = arith.constant 0 : i32
    %c0_i32_1 = arith.constant 0 : i32
    return %c0_i32, %c0_i32_0 : i32, i32
  }
  func.func @transform_2(%arg0: i32) -> (i32, i32) {
    %c0_i32 = arith.constant 0 : i32
    %c0_i32_0 = arith.constant 0 : i32
    %c0_i32_1 = arith.constant 0 : i32
    return %c0_i32, %c0_i32_0 : i32, i32
  }
  func.func @transform_3(%arg0: i32) -> (i32, i32) {
    %c0_i32 = arith.constant 0 : i32
    %c0_i32_0 = arith.constant 0 : i32
    %c0_i32_1 = arith.constant 0 : i32
    return %c0_i32, %c0_i32_0 : i32, i32
  }
  func.func @transform_4(%arg0: i32) -> (i32, i32) {
    %c0_i32 = arith.constant 0 : i32
    %c0_i32_0 = arith.constant 0 : i32
    %c0_i32_1 = arith.constant 0 : i32
    return %c0_i32, %c0_i32_0 : i32, i32
  }
  func.func @transform_5(%arg0: i32) -> (i32, i32) {
    %c0_i32 = arith.constant 0 : i32
    %c0_i32_0 = arith.constant 0 : i32
    return %arg0, %c0_i32 : i32, i32
  }
}

module attributes {stable_mosaic.version = 11 : i64} {
  func.func @_matmul_bias_res_kernel(%arg0: i32, %arg1: memref<32x64xf32, #tpu.memory_space<vmem>>, %arg2: memref<64x32xf32, #tpu.memory_space<vmem>>, %arg3: memref<1x32xf32, #tpu.memory_space<vmem>>, %arg4: memref<32x32xf32, #tpu.memory_space<vmem>>, %arg5: memref<32x32xf32, #tpu.memory_space<vmem>>) attributes {dimension_semantics = [#tpu.dimension_semantics<parallel>], iteration_bounds = array<i64: 1>, scalar_prefetch = 0 : i64, scratch_operands = 0 : i64, tpu.core_type = #tpu.core_type<tc>, window_params = [{transform_indices = @transform_0, window_bounds = array<i64: 32, 64>}, {pipeline_mode = #tpu.pipeline_mode<synchronous>, transform_indices = @transform_1, window_bounds = array<i64: 64, 32>}, {pipeline_mode = #tpu.pipeline_mode<synchronous>, transform_indices = @transform_2, window_bounds = array<i64: 1, 32>}, {transform_indices = @transform_3, window_bounds = array<i64: 32, 32>}, {transform_indices = @transform_4, window_bounds = array<i64: 32, 32>}]} {
    %c0 = arith.constant 0 : index
    %c0_0 = arith.constant 0 : index
    %0 = vector.load %arg1[%c0, %c0_0] : memref<32x64xf32, #tpu.memory_space<vmem>>, vector<32x64xf32>
    %c0_1 = arith.constant 0 : index
    %c0_2 = arith.constant 0 : index
    %1 = vector.load %arg2[%c0_1, %c0_2] : memref<64x32xf32, #tpu.memory_space<vmem>>, vector<64x32xf32>
    %cst = arith.constant dense<0.000000e+00> : vector<32x32xf32>
    %2 = tpu.matmul %0, %1, %cst {dimension_numbers = #tpu.dot_dimension_numbers<[1], [0], [0], [1], [0, 0, 1, 1], [], []>} : vector<32x64xf32>, vector<64x32xf32>, vector<32x32xf32> -> vector<32x32xf32>
    %c0_3 = arith.constant 0 : index
    %c0_4 = arith.constant 0 : index
    %3 = vector.load %arg3[%c0_3, %c0_4] : memref<1x32xf32, #tpu.memory_space<vmem>>, vector<1x32xf32>
    %4 = vector.broadcast %3 : vector<1x32xf32> to vector<32x32xf32>
    %5 = arith.addf %2, %4 : vector<32x32xf32>
    %c0_5 = arith.constant 0 : index
    %c0_6 = arith.constant 0 : index
    %6 = vector.load %arg4[%c0_5, %c0_6] : memref<32x32xf32, #tpu.memory_space<vmem>>, vector<32x32xf32>
    %7 = arith.addf %5, %6 : vector<32x32xf32>
    %c0_7 = arith.constant 0 : index
    %c0_8 = arith.constant 0 : index
    %8 = vector.load %arg5[%c0_7, %c0_8] : memref<32x32xf32, #tpu.memory_space<vmem>>, vector<32x32xf32>
    tpu.vector_store %arg5[%c0_7, %c0_8], %7 {strides = array<i32>} : memref<32x32xf32, #tpu.memory_space<vmem>>, vector<32x32xf32>,
    return
  }
  func.func @transform_0(%arg0: i32) -> (i32, i32) {
    %c0_i32 = arith.constant 0 : i32
    %c0_i32_0 = arith.constant 0 : i32
    return %arg0, %c0_i32 : i32, i32
  }
  func.func @transform_1(%arg0: i32) -> (i32, i32) {
    %c0_i32 = arith.constant 0 : i32
    %c0_i32_0 = arith.constant 0 : i32
    %c0_i32_1 = arith.constant 0 : i32
    return %c0_i32, %c0_i32_0 : i32, i32
  }
  func.func @transform_2(%arg0: i32) -> (i32, i32) {
    %c0_i32 = arith.constant 0 : i32
    %c0_i32_0 = arith.constant 0 : i32
    %c0_i32_1 = arith.constant 0 : i32
    return %c0_i32, %c0_i32_0 : i32, i32
  }
  func.func @transform_3(%arg0: i32) -> (i32, i32) {
    %c0_i32 = arith.constant 0 : i32
    %c0_i32_0 = arith.constant 0 : i32
    return %arg0, %c0_i32 : i32, i32
  }
  func.func @transform_4(%arg0: i32) -> (i32, i32) {
    %c0_i32 = arith.constant 0 : i32
    %c0_i32_0 = arith.constant 0 : i32
    return %arg0, %c0_i32 : i32, i32
  }
}

module attributes {stable_mosaic.version = 11 : i64} {
  func.func @_ln_matmul_kernel(%arg0: i32, %arg1: memref<32x32xf32, #tpu.memory_space<vmem>>, %arg2: memref<1x32xf32, #tpu.memory_space<vmem>>, %arg3: memref<1x32xf32, #tpu.memory_space<vmem>>, %arg4: memref<32x96xf32, #tpu.memory_space<vmem>>, %arg5: memref<1x96xf32, #tpu.memory_space<vmem>>, %arg6: memref<32x96xf32, #tpu.memory_space<vmem>>) attributes {dimension_semantics = [#tpu.dimension_semantics<parallel>], iteration_bounds = array<i64: 1>, scalar_prefetch = 0 : i64, scratch_operands = 0 : i64, tpu.core_type = #tpu.core_type<tc>, window_params = [{transform_indices = @transform_0, window_bounds = array<i64: 32, 32>}, {pipeline_mode = #tpu.pipeline_mode<synchronous>, transform_indices = @transform_1, window_bounds = array<i64: 1, 32>}, {pipeline_mode = #tpu.pipeline_mode<synchronous>, transform_indices = @transform_2, window_bounds = array<i64: 1, 32>}, {pipeline_mode = #tpu.pipeline_mode<synchronous>, transform_indices = @transform_3, window_bounds = array<i64: 32, 96>}, {pipeline_mode = #tpu.pipeline_mode<synchronous>, transform_indices = @transform_4, window_bounds = array<i64: 1, 96>}, {transform_indices = @transform_5, window_bounds = array<i64: 32, 96>}]} {
    %c0 = arith.constant 0 : index
    %c0_0 = arith.constant 0 : index
    %0 = vector.load %arg1[%c0, %c0_0] : memref<32x32xf32, #tpu.memory_space<vmem>>, vector<32x32xf32>
    %cst = arith.constant dense<0.000000e+00> : vector<32xf32>
    %1 = vector.multi_reduction <add>, %0, %cst [1] : vector<32x32xf32> to vector<32xf32>
    %2 = vector.shape_cast %1 : vector<32xf32> to vector<32x1xf32>
    %cst_1 = arith.constant 3.200000e+01 : f32
    %3 = vector.broadcast %cst_1 : f32 to vector<32x1xf32>
    %4 = arith.divf %2, %3 : vector<32x1xf32>
    %5 = vector.broadcast %4 : vector<32x1xf32> to vector<32x32xf32>
    %6 = arith.subf %0, %5 : vector<32x32xf32>
    %7 = arith.mulf %6, %6 : vector<32x32xf32>
    %cst_2 = arith.constant dense<0.000000e+00> : vector<32xf32>
    %8 = vector.multi_reduction <add>, %7, %cst_2 [1] : vector<32x32xf32> to vector<32xf32>
    %9 = vector.shape_cast %8 : vector<32xf32> to vector<32x1xf32>
    %cst_3 = arith.constant 3.200000e+01 : f32
    %10 = vector.broadcast %cst_3 : f32 to vector<32x1xf32>
    %11 = arith.divf %9, %10 : vector<32x1xf32>
    %cst_4 = arith.constant 9.99999974E-6 : f32
    %12 = vector.broadcast %cst_4 : f32 to vector<32x1xf32>
    %13 = arith.addf %11, %12 : vector<32x1xf32>
    %14 = math.rsqrt %13 : vector<32x1xf32>
    %15 = vector.broadcast %14 : vector<32x1xf32> to vector<32x32xf32>
    %16 = arith.mulf %6, %15 : vector<32x32xf32>
    %c0_5 = arith.constant 0 : index
    %c0_6 = arith.constant 0 : index
    %17 = vector.load %arg2[%c0_5, %c0_6] : memref<1x32xf32, #tpu.memory_space<vmem>>, vector<1x32xf32>
    %18 = vector.broadcast %17 : vector<1x32xf32> to vector<32x32xf32>
    %19 = arith.mulf %16, %18 : vector<32x32xf32>
    %c0_7 = arith.constant 0 : index
    %c0_8 = arith.constant 0 : index
    %20 = vector.load %arg3[%c0_7, %c0_8] : memref<1x32xf32, #tpu.memory_space<vmem>>, vector<1x32xf32>
    %21 = vector.broadcast %20 : vector<1x32xf32> to vector<32x32xf32>
    %22 = arith.addf %19, %21 : vector<32x32xf32>
    %c0_9 = arith.constant 0 : index
    %c0_10 = arith.constant 0 : index
    %23 = vector.load %arg4[%c0_9, %c0_10] : memref<32x96xf32, #tpu.memory_space<vmem>>, vector<32x96xf32>
    %cst_11 = arith.constant dense<0.000000e+00> : vector<32x96xf32>
    %24 = tpu.matmul %22, %23, %cst_11 {dimension_numbers = #tpu.dot_dimension_numbers<[1], [0], [0], [1], [0, 0, 1, 1], [], []>} : vector<32x32xf32>, vector<32x96xf32>, vector<32x96xf32> -> vector<32x96xf32>
    %c0_12 = arith.constant 0 : index
    %c0_13 = arith.constant 0 : index
    %25 = vector.load %arg5[%c0_12, %c0_13] : memref<1x96xf32, #tpu.memory_space<vmem>>, vector<1x96xf32>
    %26 = vector.broadcast %25 : vector<1x96xf32> to vector<32x96xf32>
    %27 = arith.addf %24, %26 : vector<32x96xf32>
    %c0_14 = arith.constant 0 : index
    %c0_15 = arith.constant 0 : index
    %28 = vector.load %arg6[%c0_14, %c0_15] : memref<32x96xf32, #tpu.memory_space<vmem>>, vector<32x96xf32>
    tpu.vector_store %arg6[%c0_14, %c0_15], %27 {strides = array<i32>} : memref<32x96xf32, #tpu.memory_space<vmem>>, vector<32x96xf32>,
    return
  }
  func.func @transform_0(%arg0: i32) -> (i32, i32) {
    %c0_i32 = arith.constant 0 : i32
    %c0_i32_0 = arith.constant 0 : i32
    return %arg0, %c0_i32 : i32, i32
  }
  func.func @transform_1(%arg0: i32) -> (i32, i32) {
    %c0_i32 = arith.constant 0 : i32
    %c0_i32_0 = arith.constant 0 : i32
    %c0_i32_1 = arith.constant 0 : i32
    return %c0_i32, %c0_i32_0 : i32, i32
  }
  func.func @transform_2(%arg0: i32) -> (i32, i32) {
    %c0_i32 = arith.constant 0 : i32
    %c0_i32_0 = arith.constant 0 : i32
    %c0_i32_1 = arith.constant 0 : i32
    return %c0_i32, %c0_i32_0 : i32, i32
  }
  func.func @transform_3(%arg0: i32) -> (i32, i32) {
    %c0_i32 = arith.constant 0 : i32
    %c0_i32_0 = arith.constant 0 : i32
    %c0_i32_1 = arith.constant 0 : i32
    return %c0_i32, %c0_i32_0 : i32, i32
  }
  func.func @transform_4(%arg0: i32) -> (i32, i32) {
    %c0_i32 = arith.constant 0 : i32
    %c0_i32_0 = arith.constant 0 : i32
    %c0_i32_1 = arith.constant 0 : i32
    return %c0_i32, %c0_i32_0 : i32, i32
  }
  func.func @transform_5(%arg0: i32) -> (i32, i32) {
    %c0_i32 = arith.constant 0 : i32
    %c0_i32_0 = arith.constant 0 : i32
    return %arg0, %c0_i32 : i32, i32
  }
}

module attributes {stable_mosaic.version = 11 : i64} {
  func.func @_matmul_bias_res_kernel(%arg0: i32, %arg1: memref<32x64xf32, #tpu.memory_space<vmem>>, %arg2: memref<64x32xf32, #tpu.memory_space<vmem>>, %arg3: memref<1x32xf32, #tpu.memory_space<vmem>>, %arg4: memref<32x32xf32, #tpu.memory_space<vmem>>, %arg5: memref<32x32xf32, #tpu.memory_space<vmem>>) attributes {dimension_semantics = [#tpu.dimension_semantics<parallel>], iteration_bounds = array<i64: 1>, scalar_prefetch = 0 : i64, scratch_operands = 0 : i64, tpu.core_type = #tpu.core_type<tc>, window_params = [{transform_indices = @transform_0, window_bounds = array<i64: 32, 64>}, {pipeline_mode = #tpu.pipeline_mode<synchronous>, transform_indices = @transform_1, window_bounds = array<i64: 64, 32>}, {pipeline_mode = #tpu.pipeline_mode<synchronous>, transform_indices = @transform_2, window_bounds = array<i64: 1, 32>}, {transform_indices = @transform_3, window_bounds = array<i64: 32, 32>}, {transform_indices = @transform_4, window_bounds = array<i64: 32, 32>}]} {
    %c0 = arith.constant 0 : index
    %c0_0 = arith.constant 0 : index
    %0 = vector.load %arg1[%c0, %c0_0] : memref<32x64xf32, #tpu.memory_space<vmem>>, vector<32x64xf32>
    %c0_1 = arith.constant 0 : index
    %c0_2 = arith.constant 0 : index
    %1 = vector.load %arg2[%c0_1, %c0_2] : memref<64x32xf32, #tpu.memory_space<vmem>>, vector<64x32xf32>
    %cst = arith.constant dense<0.000000e+00> : vector<32x32xf32>
    %2 = tpu.matmul %0, %1, %cst {dimension_numbers = #tpu.dot_dimension_numbers<[1], [0], [0], [1], [0, 0, 1, 1], [], []>} : vector<32x64xf32>, vector<64x32xf32>, vector<32x32xf32> -> vector<32x32xf32>
    %c0_3 = arith.constant 0 : index
    %c0_4 = arith.constant 0 : index
    %3 = vector.load %arg3[%c0_3, %c0_4] : memref<1x32xf32, #tpu.memory_space<vmem>>, vector<1x32xf32>
    %4 = vector.broadcast %3 : vector<1x32xf32> to vector<32x32xf32>
    %5 = arith.addf %2, %4 : vector<32x32xf32>
    %c0_5 = arith.constant 0 : index
    %c0_6 = arith.constant 0 : index
    %6 = vector.load %arg4[%c0_5, %c0_6] : memref<32x32xf32, #tpu.memory_space<vmem>>, vector<32x32xf32>
    %7 = arith.addf %5, %6 : vector<32x32xf32>
    %c0_7 = arith.constant 0 : index
    %c0_8 = arith.constant 0 : index
    %8 = vector.load %arg5[%c0_7, %c0_8] : memref<32x32xf32, #tpu.memory_space<vmem>>, vector<32x32xf32>
    tpu.vector_store %arg5[%c0_7, %c0_8], %7 {strides = array<i32>} : memref<32x32xf32, #tpu.memory_space<vmem>>, vector<32x32xf32>,
    return
  }
  func.func @transform_0(%arg0: i32) -> (i32, i32) {
    %c0_i32 = arith.constant 0 : i32
    %c0_i32_0 = arith.constant 0 : i32
    return %arg0, %c0_i32 : i32, i32
  }
  func.func @transform_1(%arg0: i32) -> (i32, i32) {
    %c0_i32 = arith.constant 0 : i32
    %c0_i32_0 = arith.constant 0 : i32
    %c0_i32_1 = arith.constant 0 : i32
    return %c0_i32, %c0_i32_0 : i32, i32
  }
  func.func @transform_2(%arg0: i32) -> (i32, i32) {
    %c0_i32 = arith.constant 0 : i32
    %c0_i32_0 = arith.constant 0 : i32
    %c0_i32_1 = arith.constant 0 : i32
    return %c0_i32, %c0_i32_0 : i32, i32
  }
  func.func @transform_3(%arg0: i32) -> (i32, i32) {
    %c0_i32 = arith.constant 0 : i32
    %c0_i32_0 = arith.constant 0 : i32
    return %arg0, %c0_i32 : i32, i32
  }
  func.func @transform_4(%arg0: i32) -> (i32, i32) {
    %c0_i32 = arith.constant 0 : i32
    %c0_i32_0 = arith.constant 0 : i32
    return %arg0, %c0_i32 : i32, i32
  }
}

</mosaic_0001>

<bundles_post_ra>
// kernel: transformer_forward.12
= control target key start
LH: loop header
LB: loop body
LE: loop exit
PB: predicated region body
PF: predicated region fallthrough
CT: control target
= control target key end

     0   :  { %vm32_vm0 = vcmask 261120   ;;  %s265_s1 = inlined_call_operand.vmem [shape: f32[32,32], index: 1, kind: input, shape index: {}]   ;;  %s266_s0 = inlined_call_operand.vmem [shape: f32[32,32], index: 0, kind: input, shape index: {}]   ;;  %s267_s2 = inlined_call_operand.vmem [shape: f32[1,32], index: 2, kind: input, shape index: {}]   ;;  %s268_s3 = inlined_call_operand.vmem [shape: f32[32,32], index: 3, kind: input, shape index: {}]   ;;  %s269_s4 = inlined_call_operand.vmem [shape: f32[32,32], index: 4, kind: output, shape index: {}]  }
   0x1   :  { %v24_v0 = vld [vmem:[%s265_s1 + $0x18] sm:$0xff]  ;;  %v23_v1 = vld [vmem:[%s265_s1 + $0x10] sm:$0xff]  ;;  %v22_v2 = vld [vmem:[%s265_s1 + $0x8] sm:$0xff] }
   0x2   :  { %159 = vmatprep.subr.mxu0 %v24_v0  ;;  %173 = vmatprep.subr.mxu1 %v24_v0  ;;  %v21_v3 = vld [vmem:[%s265_s1] sm:$0xff]  ;;  %v19_v5 = vld [vmem:[%s266_s0 + $0x10] sm:$0xff]  ;;  %v18_v6 = vld [vmem:[%s266_s0 + $0x8] sm:$0xff] }
   0x3   :  { %160 = vmatpush3.msra.mxu0 %v24_v0  ;;  %177 = vmatpush3.msra.mxu1 %v24_v0  ;;  %v17_v4 = vld [vmem:[%s266_s0] sm:$0xff]  ;;  %v20_v7 = vld [vmem:[%s266_s0 + $0x18] sm:$0xff]  ;;  %v131_v10 = vld [vmem:[%s268_s3 + $0x8] sm:$0xff] }
   0x4   :  { %161 = vmatprep.subr.mxu0 %v23_v1  ;;  %174 = vmatprep.subr.mxu1 %v23_v1  ;;  %v146_v8 = vld [vmem:[%s267_s2] ss:$0 sm:$0xff]  ;;  %v133_v12 = vld [vmem:[%s268_s3 + $0x18] sm:$0xff]  ;;  %v132_v18 = vld [vmem:[%s268_s3 + $0x10] sm:$0xff] }
   0x5   :  { %162 = vmatpush3.msra.mxu0 %v23_v1  ;;  %178 = vmatpush3.msra.mxu1 %v23_v1  ;;  %v130_v16 = vld [vmem:[%s268_s3] sm:$0xff] }
   0x6   :  { %163 = vmatprep.subr.mxu0 %v22_v2  ;;  %175 = vmatprep.subr.mxu1 %v22_v2 }
   0x7   :  { %164 = vmatpush3.msra.mxu0 %v22_v2  ;;  %179 = vmatpush3.msra.mxu1 %v22_v2 }
   0x8   :  { %165 = vmatprep.subr.mxu0 %v21_v3  ;;  %176 = vmatprep.subr.mxu1 %v21_v3 }
   0x9   :  { %166 = vmatpush3.msra.mxu0 %v21_v3  ;;  %180 = vmatpush3.msra.mxu1 %v21_v3 }
   0xa   :  { %167 = vmatprep.mubr.msk.f32.mxu0 %vm32_vm0, %v17_v4  ;;  %170 = vmatprep.mubr.msk.f32.mxu1 %vm32_vm0, %v19_v5 }
   0xb   :  { %168 = vmatmul.mubr.msk.f32.vlgmr.msra.gmra.mxu0 %vm32_vm0, %v18_v6  ;;  %171 = vmatmul.mubr.msk.f32.vlgmr.msra.gmra.mxu1 %vm32_vm0, %v20_v7 }
  0xcb   :  { %v169_v9 = vpop.f32.mrf.mxu0  ;;  %v172_v11 = vpop.f32.mrf.mxu1 }
  0xcc   :  { %v117_v13 = vadd.f32 %v169_v9, %v146_v8  ;;  %v127_v14 = vadd.f32 %v172_v11, %v146_v8 }
  0xcd   :  { %v111_v15 = vpop.f32.mrf.mxu0  ;;  %v121_v17 = vpop.f32.mrf.mxu1 }
  0xce   :  { %v135_v19 = vadd.f32 %v131_v10, %v117_v13  ;;  %v137_v20 = vadd.f32 %v133_v12, %v127_v14  ;;  %v112_v21 = vadd.f32 %v146_v8, %v111_v15  ;;  %v122_v22 = vadd.f32 %v146_v8, %v121_v17 }
  0xd0   :  { %139 = vst.msk [vmem:[%s269_s4 + $0x8] sm:$0xff] %vm32_vm0, %v135_v19  ;;  %141 = vst.msk [vmem:[%s269_s4 + $0x18] sm:$0xff] %vm32_vm0, %v137_v20  ;;  %v134_v23 = vadd.f32 %v130_v16, %v112_v21  ;;  %v136_v24 = vadd.f32 %v132_v18, %v122_v22 }
  0xd2   :  { %138 = vst.msk [vmem:[%s269_s4] sm:$0xff] %vm32_vm0, %v134_v23  ;;  %140 = vst.msk [vmem:[%s269_s4 + $0x10] sm:$0xff] %vm32_vm0, %v136_v24 }

// kernel: transformer_forward.10
= control target key start
LH: loop header
LB: loop body
LE: loop exit
PB: predicated region body
PF: predicated region fallthrough
CT: control target
= control target key end

     0   :  { %10 = vsyncpa [#allocation3], 0  ;;  %s302_s18 = smov [#allocation2]   ;;  %s388_s0 = inlined_call_operand.vmem [shape: f32[32,32], index: 0, kind: input, shape index: {}]   ;;  %s389_s1 = inlined_call_operand.vmem [shape: f32[1,32], index: 1, kind: input, shape index: {}]   ;;  %s390_s2 = inlined_call_operand.vmem [shape: f32[1,32], index: 2, kind: input, shape index: {}]   ;;  %s391_s3 = inlined_call_operand.hbm [shape: f32[32,96], index: 3, kind: input, shape index: {}]   ;;  %s392_s4 = inlined_call_operand.vmem [shape: f32[1,96], index: 4, kind: input, shape index: {}]   ;;  %s393_s5 = inlined_call_operand.vmem [shape: f32[32,96], index: 5, kind: output, shape index: {}]  }
   0x1   :  { %s22_s19 = sshll.u32 %s302_s18, 4  ;;  %s23_s19 = int_to_ptr.vmem [resolvable:$true] %s22_s19 }
   0x2   :  { %s288_s20 = scalar_lea.vmem %s23_s19, 512  ;;  %p293_p1 = scmp.lt.s32.totalorder %s23_s19, %s23_s19 }
   0x3   :  { %p289_p0 = scmp.ne.s32.totalorder %s23_s19, %s288_s20  ;;  %p294_p2 = scmp.lt.s32.totalorder %s288_s20, %s288_s20 }
   0x5   :  { %p295_p3 = por %p294_p2, %p293_p1 }
   0x7   :  { %p296_p4 = pnand %p295_p3, %p289_p0 }
   0x9   :  { %299 = shalt.err (!%p296_p4)
}
   0xa   :  { %s303_s21 = smov 128   ;;  %s304_s22 = smov 8  }
   0xb   :  { %28 = dma.hbm_to_vmem [thread:$0]  %s391_s3, 512, %s23_s19, [#allocation3], %s303_s21, %s303_s21, %s304_s22  }
   0xc   :  { %300 = dma.done.wait [#allocation3], 512  }
   0xd   :  { %301 = vsyncadd [#allocation3], 4294966784  ;;  %vm38_vm0 = vcmask 261120   ;;  %v34_v0 = vld [vmem:[%s388_s0] sm:$0xff]  ;;  %v35_v1 = vld [vmem:[%s388_s0 + $0x8] sm:$0xff]  ;;  %vm222_vm1 = vcmask 785408  }
   0xe   :  { %v36_v2 = vld [vmem:[%s388_s0 + $0x10] sm:$0xff]  ;;  %v39_v3 = vsel %vm38_vm0, %v34_v0, 0.0  ;;  %v42_v4 = vsel %vm38_vm0, %v35_v1, 0.0  ;;  %v37_v5 = vld [vmem:[%s388_s0 + $0x18] sm:$0xff]  ;;  %v115_v30 = vld [vmem:[#allocation2 + $0x8] sm:$0xff] }
   0xf   :  { %40 = vadd.xlane.f32.xlu0 %v39_v3  ;;  %43 = vadd.xlane.f32.xlu1 %v42_v4  ;;  %v45_v6 = vsel %vm38_vm0, %v36_v2, 0.0  ;;  %v48_v7 = vsel %vm38_vm0, %v37_v5, 0.0  ;;  %v117_v28 = vld [vmem:[#allocation2 + $0x18] sm:$0xff]  ;;  %v116_v29 = vld [vmem:[#allocation2 + $0x10] sm:$0xff]  ;;  %v114_v31 = vld [vmem:[#allocation2] sm:$0xff] }
  0x10   :  { %247 = vmatprep.subr.mxu0 %v117_v28  ;;  %261 = vmatprep.subr.mxu1 %v117_v28  ;;  %v232_v45 = vld [vmem:[%s389_s1] ss:$0 sm:$0xff] }
  0x11   :  { %248 = vmatpush3.msra.mxu0 %v117_v28  ;;  %265 = vmatpush3.msra.mxu1 %v117_v28  ;;  %v233_v47 = vld [vmem:[%s390_s2] ss:$0 sm:$0xff] }
  0x12   :  { %249 = vmatprep.subr.mxu0 %v116_v29  ;;  %262 = vmatprep.subr.mxu1 %v116_v29  ;;  %v234_v62 = vld [vmem:[%s392_s4] ss:$0 sm:$0xff] }
  0x13   :  { %46 = vadd.xlane.f32.xlu0 %v45_v6  ;;  %49 = vadd.xlane.f32.xlu1 %v48_v7 }
  0x14   :  { %250 = vmatpush3.msra.mxu0 %v116_v29  ;;  %266 = vmatpush3.msra.mxu1 %v116_v29 }
  0x15   :  { %251 = vmatprep.subr.mxu0 %v115_v30  ;;  %263 = vmatprep.subr.mxu1 %v115_v30 }
  0x16   :  { %252 = vmatpush3.msra.mxu0 %v115_v30  ;;  %267 = vmatpush3.msra.mxu1 %v115_v30 }
  0x17   :  { %253 = vmatprep.subr.mxu0 %v114_v31  ;;  %264 = vmatprep.subr.mxu1 %v114_v31 }
  0x18   :  { %254 = vmatpush3.msra.mxu0 %v114_v31  ;;  %268 = vmatpush3.msra.mxu1 %v114_v31 }
  0x98   :  { %v41_v8 = vpop.xlane.xlu0 %40  ;;  %v44_v9 = vpop.xlane.xlu1 %43 }
  0x99   :  { %v52_v10 = vmul.f32 0.03125, %v41_v8  ;;  %v53_v11 = vmul.f32 0.03125, %v44_v9 }
  0x9b   :  { %v56_v12 = vsub.f32 %v34_v0, %v52_v10  ;;  %v354_v13 = vsub.f32 %v35_v1, %v53_v11 }
  0x9c   :  { %v47_v14 = vpop.xlane.xlu0 %46  ;;  %v50_v15 = vpop.xlane.xlu1 %49 }
  0x9d   :  { %v54_v16 = vmul.f32 0.03125, %v47_v14  ;;  %v55_v17 = vmul.f32 0.03125, %v50_v15  ;;  %v60_v18 = vmul.f32 %v56_v12, %v56_v12  ;;  %v61_v19 = vmul.f32 %v354_v13, %v354_v13 }
  0x9f   :  { %v58_v20 = vsub.f32 %v36_v2, %v54_v16  ;;  %v59_v21 = vsub.f32 %v37_v5, %v55_v17  ;;  %v64_v22 = vsel %vm38_vm0, %v60_v18, 0.0  ;;  %v67_v23 = vsel %vm38_vm0, %v61_v19, 0.0 }
  0xa0   :  { %65 = vadd.xlane.f32.xlu0 %v64_v22 }
  0xa1   :  { %v62_v24 = vmul.f32 %v58_v20, %v58_v20  ;;  %v63_v25 = vmul.f32 %v59_v21, %v59_v21 }
  0xa3   :  { %v70_v26 = vsel %vm38_vm0, %v62_v24, 0.0  ;;  %v73_v27 = vsel %vm38_vm0, %v63_v25, 0.0 }
  0xa4   :  { %68 = vadd.xlane.f32.xlu0 %v67_v23  ;;  %71 = vadd.xlane.f32.xlu1 %v70_v26 }
  0xa8   :  { %74 = vadd.xlane.f32.xlu1 %v73_v27 }
 0x129   :  { %v66_v32 = vpop.xlane.xlu0 %65 }
 0x12a   :  { %v76_v33 = vmul.f32 0.03125, %v66_v32 }
 0x12c   :  { %v80_v34 = vadd.f32 1e-05, %v76_v33 }
 0x12d   :  { %v72_v35 = vpop.xlane.xlu1 %71  ;;  %v69_v36 = vpop.xlane.xlu0 %68 }
 0x12e   :  { %272 = vrsqrt.f32 %v80_v34  ;;  %v78_v37 = vmul.f32 0.03125, %v72_v35  ;;  %v77_v38 = vmul.f32 0.03125, %v69_v36 }
 0x130   :  { %v82_v39 = vadd.f32 1e-05, %v78_v37  ;;  %v81_v40 = vadd.f32 1e-05, %v77_v38 }
 0x131   :  { %v75_v41 = vpop.xlane.xlu1 %74 }
 0x132   :  { %274 = vrsqrt.f32 %v82_v39  ;;  %v79_v42 = vmul.f32 0.03125, %v75_v41 }
 0x133   :  { %276 = vrsqrt.f32 %v81_v40 }
 0x134   :  { %v83_v43 = vadd.f32 1e-05, %v79_v42 }
 0x136   :  { %278 = vrsqrt.f32 %v83_v43 }
 0x13b   :  { %v273_v44 = vpop.eup %272 }
 0x13c   :  { %v88_v46 = vmul.f32 %v273_v44, %v56_v12 }
 0x13e   :  { %v99_v48 = vmul.f32 %v232_v45, %v88_v46 }
 0x13f   :  { %v275_v49 = vpop.eup %274 }
 0x140   :  { %v277_v50 = vpop.eup %276  ;;  %v110_v51 = vadd.f32 %v233_v47, %v99_v48  ;;  %v90_v52 = vmul.f32 %v275_v49, %v58_v20 }
 0x141   :  { %v89_v53 = vmul.f32 %v277_v50, %v354_v13 }
 0x142   :  { %255 = vmatprep.mubr.msk.f32.mxu0 %vm38_vm0, %v110_v51  ;;  %v101_v54 = vmul.f32 %v232_v45, %v90_v52 }
 0x143   :  { %v279_v55 = vpop.eup %278  ;;  %v100_v56 = vmul.f32 %v232_v45, %v89_v53 }
 0x144   :  { %v112_v57 = vadd.f32 %v233_v47, %v101_v54  ;;  %v91_v58 = vmul.f32 %v279_v55, %v59_v21 }
 0x145   :  { %v111_v59 = vadd.f32 %v233_v47, %v100_v56 }
 0x146   :  { %258 = vmatprep.mubr.msk.f32.mxu1 %vm38_vm0, %v112_v57  ;;  %v102_v60 = vmul.f32 %v232_v45, %v91_v58 }
 0x147   :  { %256 = vmatmul.mubr.msk.f32.vlgmr.msra.gmra.mxu0 %vm38_vm0, %v111_v59 }
 0x148   :  { %v113_v61 = vadd.f32 %v233_v47, %v102_v60 }
 0x14a   :  { %259 = vmatmul.mubr.msk.f32.vlgmr.msra.gmra.mxu1 %vm38_vm0, %v113_v61 }
 0x207   :  { %v257_v63 = vpop.f32.mrf.mxu0 }
 0x208   :  { %v209_v0 = vadd.f32 %v257_v63, %v234_v62 }
 0x209   :  { %v203_v1 = vpop.f32.mrf.mxu0 }
 0x20a   :  { %224 = vst.msk [vmem:[%s393_s5 + $0x8] sm:$0xff] %vm222_vm1, %v209_v0  ;;  %v204_v2 = vadd.f32 %v234_v62, %v203_v1  ;;  %v260_v3 = vpop.f32.mrf.mxu1 }
 0x20b   :  { %v219_v4 = vadd.f32 %v260_v3, %v234_v62 }
 0x20c   :  { %223 = vst.msk [vmem:[%s393_s5] sm:$0xff] %vm222_vm1, %v204_v2  ;;  %v213_v5 = vpop.f32.mrf.mxu1 }
 0x20d   :  { %226 = vst.msk [vmem:[%s393_s5 + $0x18] sm:$0xff] %vm222_vm1, %v219_v4  ;;  %v214_v6 = vadd.f32 %v234_v62, %v213_v5 }
 0x20f   :  { %225 = vst.msk [vmem:[%s393_s5 + $0x10] sm:$0xff] %vm222_vm1, %v214_v6 }
 0x210   :  { %231 = vsyncpa [#allocation3], 1 }

// kernel: transformer_forward.13
= control target key start
LH: loop header
LB: loop body
LE: loop exit
PB: predicated region body
PF: predicated region fallthrough
CT: control target
= control target key end

     0   :  { %vm24_vm0 = vcmask 261120   ;;  %vm244_vm1 = vcmask 523264   ;;  %s407_s0 = inlined_call_operand.vmem [shape: f32[32,32], index: 0, kind: input, shape index: {}]   ;;  %s408_s3 = inlined_call_operand.vmem [shape: f32[32,64], index: 3, kind: input, shape index: {}]   ;;  %s409_s1 = inlined_call_operand.vmem [shape: f32[1,32], index: 1, kind: input, shape index: {}]   ;;  %s410_s2 = inlined_call_operand.vmem [shape: f32[1,32], index: 2, kind: input, shape index: {}]   ;;  %s411_s4 = inlined_call_operand.vmem [shape: f32[1,64], index: 4, kind: input, shape index: {}]   ;;  %s412_s5 = inlined_call_operand.vmem [shape: f32[32,64], index: 5, kind: output, shape index: {}]  }
   0x1   :  { %v20_v0 = vld [vmem:[%s407_s0] sm:$0xff]  ;;  %v21_v1 = vld [vmem:[%s407_s0 + $0x8] sm:$0xff]  ;;  %v22_v2 = vld [vmem:[%s407_s0 + $0x10] sm:$0xff] }
   0x2   :  { %v25_v3 = vsel %vm24_vm0, %v20_v0, 0.0  ;;  %v28_v4 = vsel %vm24_vm0, %v21_v1, 0.0  ;;  %v23_v5 = vld [vmem:[%s407_s0 + $0x18] sm:$0xff]  ;;  %v31_v6 = vsel %vm24_vm0, %v22_v2, 0.0  ;;  %v102_v29 = vld [vmem:[%s408_s3 + $0x10] sm:$0xff]  ;;  %v101_v30 = vld [vmem:[%s408_s3 + $0x8] sm:$0xff] }
   0x3   :  { %26 = vadd.xlane.f32.xlu0 %v25_v3  ;;  %29 = vadd.xlane.f32.xlu1 %v28_v4  ;;  %v34_v7 = vsel %vm24_vm0, %v23_v5, 0.0  ;;  %v103_v28 = vld [vmem:[%s408_s3 + $0x18] sm:$0xff]  ;;  %v100_v31 = vld [vmem:[%s408_s3] sm:$0xff] }
   0x4   :  { %268 = vmatprep.subr.mxu0 %v103_v28  ;;  %282 = vmatprep.subr.mxu1 %v103_v28  ;;  %v253_v45 = vld [vmem:[%s409_s1] ss:$0 sm:$0xff] }
   0x5   :  { %269 = vmatpush3.msra.mxu0 %v103_v28  ;;  %286 = vmatpush3.msra.mxu1 %v103_v28  ;;  %v254_v47 = vld [vmem:[%s410_s2] ss:$0 sm:$0xff] }
   0x6   :  { %270 = vmatprep.subr.mxu0 %v102_v29  ;;  %283 = vmatprep.subr.mxu1 %v102_v29  ;;  %v255_v62 = vld [vmem:[%s411_s4] ss:$0 sm:$0xff] }
   0x7   :  { %32 = vadd.xlane.f32.xlu0 %v31_v6  ;;  %35 = vadd.xlane.f32.xlu1 %v34_v7 }
   0x8   :  { %271 = vmatpush3.msra.mxu0 %v102_v29  ;;  %287 = vmatpush3.msra.mxu1 %v102_v29 }
   0x9   :  { %272 = vmatprep.subr.mxu0 %v101_v30  ;;  %284 = vmatprep.subr.mxu1 %v101_v30 }
   0xa   :  { %273 = vmatpush3.msra.mxu0 %v101_v30  ;;  %288 = vmatpush3.msra.mxu1 %v101_v30 }
   0xb   :  { %274 = vmatprep.subr.mxu0 %v100_v31  ;;  %285 = vmatprep.subr.mxu1 %v100_v31 }
   0xc   :  { %275 = vmatpush3.msra.mxu0 %v100_v31  ;;  %289 = vmatpush3.msra.mxu1 %v100_v31 }
  0x8c   :  { %v27_v8 = vpop.xlane.xlu0 %26  ;;  %v30_v9 = vpop.xlane.xlu1 %29 }
  0x8d   :  { %v38_v10 = vmul.f32 0.03125, %v27_v8  ;;  %v39_v11 = vmul.f32 0.03125, %v30_v9 }
  0x8f   :  { %v42_v12 = vsub.f32 %v20_v0, %v38_v10  ;;  %v352_v13 = vsub.f32 %v21_v1, %v39_v11 }
  0x90   :  { %v33_v14 = vpop.xlane.xlu0 %32  ;;  %v36_v15 = vpop.xlane.xlu1 %35 }
  0x91   :  { %v40_v16 = vmul.f32 0.03125, %v33_v14  ;;  %v41_v17 = vmul.f32 0.03125, %v36_v15  ;;  %v46_v18 = vmul.f32 %v42_v12, %v42_v12  ;;  %v47_v19 = vmul.f32 %v352_v13, %v352_v13 }
  0x93   :  { %v44_v20 = vsub.f32 %v22_v2, %v40_v16  ;;  %v356_v21 = vsub.f32 %v23_v5, %v41_v17  ;;  %v50_v22 = vsel %vm24_vm0, %v46_v18, 0.0  ;;  %v53_v23 = vsel %vm24_vm0, %v47_v19, 0.0 }
  0x94   :  { %51 = vadd.xlane.f32.xlu0 %v50_v22 }
  0x95   :  { %v48_v24 = vmul.f32 %v44_v20, %v44_v20  ;;  %v49_v25 = vmul.f32 %v356_v21, %v356_v21 }
  0x97   :  { %v56_v26 = vsel %vm24_vm0, %v48_v24, 0.0  ;;  %v59_v27 = vsel %vm24_vm0, %v49_v25, 0.0 }
  0x98   :  { %54 = vadd.xlane.f32.xlu0 %v53_v23  ;;  %57 = vadd.xlane.f32.xlu1 %v56_v26 }
  0x9c   :  { %60 = vadd.xlane.f32.xlu1 %v59_v27 }
 0x11d   :  { %v52_v32 = vpop.xlane.xlu0 %51 }
 0x11e   :  { %v62_v33 = vmul.f32 0.03125, %v52_v32 }
 0x120   :  { %v66_v34 = vadd.f32 1e-05, %v62_v33 }
 0x121   :  { %v58_v35 = vpop.xlane.xlu1 %57  ;;  %v55_v36 = vpop.xlane.xlu0 %54 }
 0x122   :  { %290 = vrsqrt.f32 %v66_v34  ;;  %v64_v37 = vmul.f32 0.03125, %v58_v35  ;;  %v63_v38 = vmul.f32 0.03125, %v55_v36 }
 0x124   :  { %v68_v39 = vadd.f32 1e-05, %v64_v37  ;;  %v67_v40 = vadd.f32 1e-05, %v63_v38 }
 0x125   :  { %v61_v41 = vpop.xlane.xlu1 %60 }
 0x126   :  { %292 = vrsqrt.f32 %v68_v39  ;;  %v65_v42 = vmul.f32 0.03125, %v61_v41 }
 0x127   :  { %294 = vrsqrt.f32 %v67_v40 }
 0x128   :  { %v69_v43 = vadd.f32 1e-05, %v65_v42 }
 0x12a   :  { %296 = vrsqrt.f32 %v69_v43 }
 0x12f   :  { %v291_v44 = vpop.eup %290 }
 0x130   :  { %v74_v46 = vmul.f32 %v291_v44, %v42_v12 }
 0x132   :  { %v85_v48 = vmul.f32 %v253_v45, %v74_v46 }
 0x133   :  { %v293_v49 = vpop.eup %292 }
 0x134   :  { %v295_v50 = vpop.eup %294  ;;  %v96_v51 = vadd.f32 %v254_v47, %v85_v48  ;;  %v76_v52 = vmul.f32 %v293_v49, %v44_v20 }
 0x135   :  { %v75_v53 = vmul.f32 %v295_v50, %v352_v13 }
 0x136   :  { %276 = vmatprep.mubr.msk.f32.mxu0 %vm24_vm0, %v96_v51  ;;  %v87_v54 = vmul.f32 %v253_v45, %v76_v52 }
 0x137   :  { %v297_v55 = vpop.eup %296  ;;  %v86_v56 = vmul.f32 %v253_v45, %v75_v53 }
 0x138   :  { %v98_v57 = vadd.f32 %v254_v47, %v87_v54  ;;  %v77_v58 = vmul.f32 %v297_v55, %v356_v21 }
 0x139   :  { %v97_v59 = vadd.f32 %v254_v47, %v86_v56 }
 0x13a   :  { %279 = vmatprep.mubr.msk.f32.mxu1 %vm24_vm0, %v98_v57  ;;  %v88_v60 = vmul.f32 %v253_v45, %v77_v58 }
 0x13b   :  { %277 = vmatmul.mubr.msk.f32.vlgmr.msra.gmra.mxu0 %vm24_vm0, %v97_v59 }
 0x13c   :  { %v99_v61 = vadd.f32 %v254_v47, %v88_v60 }
 0x13e   :  { %280 = vmatmul.mubr.msk.f32.vlgmr.msra.gmra.mxu1 %vm24_vm0, %v99_v61 }
 0x1fb   :  { %v278_v63 = vpop.f32.mrf.mxu0 }
 0x1fc   :  { %v195_v0 = vadd.f32 %v278_v63, %v255_v62 }
 0x1fd   :  { %v189_v1 = vpop.f32.mrf.mxu0 }
 0x1fe   :  { %v213_v2 = vmul.f32 0.044715, %v195_v0  ;;  %v190_v3 = vadd.f32 %v255_v62, %v189_v1  ;;  %v281_v4 = vpop.f32.mrf.mxu1  ;;  %v209_v28 = vmul.f32 0.5, %v195_v0 }
 0x1ff   :  { %v205_v5 = vadd.f32 %v281_v4, %v255_v62 }
 0x200   :  { %v217_v6 = vmul.f32 %v213_v2, %v195_v0  ;;  %v212_v7 = vmul.f32 0.044715, %v190_v3  ;;  %v199_v8 = vpop.f32.mrf.mxu1  ;;  %v208_v33 = vmul.f32 0.5, %v190_v3 }
 0x201   :  { %v215_v9 = vmul.f32 0.044715, %v205_v5  ;;  %v200_v10 = vadd.f32 %v255_v62, %v199_v8  ;;  %v211_v35 = vmul.f32 0.5, %v205_v5 }
 0x202   :  { %v221_v11 = vmul.f32 %v217_v6, %v195_v0  ;;  %v216_v12 = vmul.f32 %v212_v7, %v190_v3 }
 0x203   :  { %v219_v13 = vmul.f32 %v215_v9, %v205_v5  ;;  %v214_v14 = vmul.f32 0.044715, %v200_v10  ;;  %v210_v40 = vmul.f32 0.5, %v200_v10 }
 0x204   :  { %v225_v15 = vadd.f32 %v221_v11, %v195_v0  ;;  %v220_v16 = vmul.f32 %v216_v12, %v190_v3 }
 0x205   :  { %v223_v17 = vmul.f32 %v219_v13, %v205_v5  ;;  %v218_v18 = vmul.f32 %v214_v14, %v200_v10 }
 0x206   :  { %v229_v19 = vmul.f32 0.7978846, %v225_v15  ;;  %v224_v20 = vadd.f32 %v220_v16, %v190_v3 }
 0x207   :  { %v227_v21 = vadd.f32 %v223_v17, %v205_v5  ;;  %v222_v22 = vmul.f32 %v218_v18, %v200_v10 }
 0x208   :  { %298 = vtanh.f32 %v229_v19  ;;  %v228_v23 = vmul.f32 0.7978846, %v224_v20 }
 0x209   :  { %v231_v24 = vmul.f32 0.7978846, %v227_v21  ;;  %v226_v25 = vadd.f32 %v222_v22, %v200_v10 }
 0x20a   :  { %300 = vtanh.f32 %v228_v23 }
 0x20b   :  { %302 = vtanh.f32 %v231_v24  ;;  %v230_v26 = vmul.f32 0.7978846, %v226_v25 }
 0x20d   :  { %304 = vtanh.f32 %v230_v26 }
 0x215   :  { %v299_v27 = vpop.eup %298 }
 0x216   :  { %v237_v29 = vadd.f32 1.0, %v299_v27 }
 0x217   :  { %v301_v30 = vpop.eup %300 }
 0x218   :  { %v303_v31 = vpop.eup %302  ;;  %v241_v32 = vmul.f32 %v237_v29, %v209_v28  ;;  %v236_v34 = vadd.f32 1.0, %v301_v30 }
 0x219   :  { %v239_v36 = vadd.f32 1.0, %v303_v31 }
 0x21a   :  { %v305_v37 = vpop.eup %304  ;;  %246 = vst.msk [vmem:[%s412_s5 + $0x8] sm:$0xff] %vm244_vm1, %v241_v32  ;;  %v240_v38 = vmul.f32 %v236_v34, %v208_v33 }
 0x21b   :  { %v243_v39 = vmul.f32 %v239_v36, %v211_v35  ;;  %v238_v41 = vadd.f32 1.0, %v305_v37 }
 0x21c   :  { %245 = vst.msk [vmem:[%s412_s5] sm:$0xff] %vm244_vm1, %v240_v38 }
 0x21d   :  { %248 = vst.msk [vmem:[%s412_s5 + $0x18] sm:$0xff] %vm244_vm1, %v243_v39  ;;  %v242_v42 = vmul.f32 %v238_v41, %v210_v40 }
 0x21f   :  { %247 = vst.msk [vmem:[%s412_s5 + $0x10] sm:$0xff] %vm244_vm1, %v242_v42 }

// kernel: transformer_forward.11
= control target key start
LH: loop header
LB: loop body
LE: loop exit
PB: predicated region body
PF: predicated region fallthrough
CT: control target
= control target key end

     0   :  { %s1316_s12 = smov 0   ;;  %s1441_s0 = inlined_call_operand.vmem [shape: f32[8,16,8], index: 0, kind: input, shape index: {}]   ;;  %s1442_s1 = inlined_call_operand.vmem [shape: f32[8,16,8], index: 1, kind: input, shape index: {}]   ;;  %s1443_s2 = inlined_call_operand.vmem [shape: f32[8,16,8], index: 2, kind: input, shape index: {}]   ;;  %s1444_s3 = inlined_call_operand.vmem [shape: f32[8,16,8], index: 3, kind: output, shape index: {}]  }
   0x1 LB: > { %s1113_s13 = sadd.s32 4294967295, %s1294_s12   ;;  %p1117_p0 = scmp.ge.s32.totalorder %s1294_s12, 1  ;;  %s1294_s12 = sphi %s1316_s12, %s13_s12  }
   0x2   : > { %p163_p1 = scmp.lt.s32.totalorder %s1294_s12, 3 }
   0x4   : > { %p164_p2 = pnand %p1117_p0, %p163_p1 }
   0x5   : > { %s1118_s14 = sshll.u32 (!%p164_p2), %s1113_s13, 2 }
   0x6   : > { %167 = sbr.rel (%p164_p2) target bundleno = 743 (0x2e7), region = 32  ;;  %p202_p3 = scmp.lt.s32.totalorder (!%p164_p2), %s1118_s14, 7 }
   0xb   : > { %s1446_s14 = smov (!%p202_p3, %s1118_s14), 7  ;;  %vm253_vm0 = vcmask 64512   ;;  %vm610_vm1 = vcmask 130048  }
   0xc   : > { %s1324_s15 = sshll.u32 %s1446_s14, 4 }
   0xd   : > { %s213_s18 = scalar_lea.vmem %s1442_s1, %s1324_s15  ;;  %s1334_s21 = scalar_lea.vmem %s1441_s0, %s1324_s15 }
   0xe   : > { %v238_v0 = vld [vmem:[%s213_s18 + $0x8] sm:$0xff]  ;;  %v240_v1 = vld [vmem:[%s213_s18 + $0x18] sm:$0xff]  ;;  %v237_v2 = vld [vmem:[%s213_s18] sm:$0xff]  ;;  %s1403_s24 = scalar_lea.vmem %s1443_s2, %s1324_s15  ;;  %s227_s27 = scalar_lea.vmem %s1444_s3, %s1324_s15 }
   0xf   : > { %1192 = vmatprep.subr.msk.mxu0 %vm253_vm0, %v238_v0  ;;  %1199 = vmatprep.subr.msk.mxu1 %vm253_vm0, %v240_v1  ;;  %v239_v3 = vld [vmem:[%s213_s18 + $0x10] sm:$0xff]  ;;  %v229_v4 = vld [vmem:[%s1334_s21] sm:$0xff]  ;;  %v242_v6 = vld [vmem:[%s213_s18 + $0x28] sm:$0xff] }
  0x10   : > { %v231_v5 = vld [vmem:[%s1334_s21 + $0x10] sm:$0xff]  ;;  %1193 = vmatpush3.xpose.msk.msra.mxu0 %vm253_vm0, %v238_v0  ;;  %1200 = vmatpush3.xpose.msk.msra.mxu1 %vm253_vm0, %v240_v1  ;;  %v244_v7 = vld [vmem:[%s213_s18 + $0x38] sm:$0xff]  ;;  %v230_v8 = vld [vmem:[%s1334_s21 + $0x8] sm:$0xff] }
  0x11   : > { %1194 = vmatprep.subr.msk.mxu0 %vm253_vm0, %v237_v2  ;;  %1201 = vmatprep.subr.msk.mxu1 %vm253_vm0, %v239_v3  ;;  %v232_v9 = vld [vmem:[%s1334_s21 + $0x18] sm:$0xff]  ;;  %v241_v10 = vld [vmem:[%s213_s18 + $0x20] sm:$0xff]  ;;  %v243_v12 = vld [vmem:[%s213_s18 + $0x30] sm:$0xff] }
  0x12   : > { %1196 = vmatprep.mubr.msk.f32.mxu0 %vm253_vm0, %v229_v4  ;;  %1203 = vmatprep.mubr.msk.f32.mxu1 %vm253_vm0, %v231_v5  ;;  %v233_v11 = vld [vmem:[%s1334_s21 + $0x20] sm:$0xff]  ;;  %v235_v13 = vld [vmem:[%s1334_s21 + $0x30] sm:$0xff]  ;;  %v234_v14 = vld [vmem:[%s1334_s21 + $0x28] sm:$0xff] }
  0x13   : > { %v236_v15 = vld [vmem:[%s1334_s21 + $0x38] sm:$0xff] }
  0x14   : > { %1195 = vmatpush3.xpose.msk.msra.mxu0 %vm253_vm0, %v237_v2  ;;  %1202 = vmatpush3.xpose.msk.msra.mxu1 %vm253_vm0, %v239_v3 }
  0x15   : > { %1206 = vmatprep.subr.msk.mxu0 %vm253_vm0, %v242_v6  ;;  %1213 = vmatprep.subr.msk.mxu1 %vm253_vm0, %v244_v7 }
  0x17   : > { %1197 = vmatmul.mubr.msk.f32.vlgmr.msra.gmra.mxu0 %vm253_vm0, %v230_v8  ;;  %1204 = vmatmul.mubr.msk.f32.vlgmr.msra.gmra.mxu1 %vm253_vm0, %v232_v9 }
  0x18   : > { %1207 = vmatpush3.xpose.msk.msra.mxu0 %vm253_vm0, %v242_v6  ;;  %1214 = vmatpush3.xpose.msk.msra.mxu1 %vm253_vm0, %v244_v7 }
  0x19   : > { %1208 = vmatprep.subr.msk.mxu0 %vm253_vm0, %v241_v10  ;;  %1210 = vmatprep.mubr.msk.f32.mxu0 %vm253_vm0, %v233_v11 }
  0x1a   : > { %1215 = vmatprep.subr.msk.mxu1 %vm253_vm0, %v243_v12  ;;  %1217 = vmatprep.mubr.msk.f32.mxu1 %vm253_vm0, %v235_v13 }
  0x1c   : > { %1209 = vmatpush3.xpose.msk.msra.mxu0 %vm253_vm0, %v241_v10  ;;  %1216 = vmatpush3.xpose.msk.msra.mxu1 %vm253_vm0, %v243_v12 }
  0x1f   : > { %1211 = vmatmul.mubr.msk.f32.vlgmr.msra.gmra.mxu0 %vm253_vm0, %v234_v14  ;;  %1218 = vmatmul.mubr.msk.f32.vlgmr.msra.gmra.mxu1 %vm253_vm0, %v236_v15 }
  0xd7   : > { %v1198_v16 = vpop.f32.mrf.mxu0  ;;  %v1205_v17 = vpop.f32.mrf.mxu1 }
  0xd8   : > { %v603_v18 = vmul.f32 0.35355338, %v1198_v16  ;;  %v605_v19 = vmul.f32 0.35355338, %v1205_v17  ;;  %v246_v16 = vld [vmem:[%s1403_s24 + $0x8] sm:$0xff]  ;;  %v245_v17 = vld [vmem:[%s1403_s24] sm:$0xff] }
  0xd9   : > { %v332_v20 = vpop.f32.mrf.mxu0  ;;  %v419_v21 = vpop.f32.mrf.mxu1  ;;  %1220 = vmatprep.subr.mxu0 %v246_v16 }
  0xda   : > { %v602_v22 = vmul.f32 0.35355338, %v332_v20  ;;  %v620_v23 = vsel %vm610_vm1, %v605_v19, -inf  ;;  %v604_v24 = vmul.f32 0.35355338, %v419_v21  ;;  %v614_v25 = vsel %vm610_vm1, %v603_v18, -inf  ;;  %1221 = vmatpush3.msra.mxu0 %v246_v16 }
  0xdb   : > { %621 = vmax.xlane.f32.xlu1 %v620_v23  ;;  %615 = vmax.xlane.f32.xlu0 %v614_v25  ;;  %v250_v20 = vld [vmem:[%s1403_s24 + $0x28] sm:$0xff]  ;;  %v252_v21 = vld [vmem:[%s1403_s24 + $0x38] sm:$0xff] }
  0xdc   : > { %v617_v26 = vsel %vm610_vm1, %v604_v24, -inf  ;;  %v611_v27 = vsel %vm610_vm1, %v602_v22, -inf  ;;  %1222 = vmatprep.subr.mxu0 %v245_v17 }
  0xdd   : > { %1223 = vmatpush3.msra.mxu0 %v245_v17 }
  0xde   : > { %1234 = vmatprep.subr.mxu0 %v250_v20 }
  0xdf   : > { %618 = vmax.xlane.f32.xlu1 %v617_v26  ;;  %612 = vmax.xlane.f32.xlu0 %v611_v27  ;;  %v1212_v28 = vpop.f32.mrf.mxu0  ;;  %v1219_v29 = vpop.f32.mrf.mxu1 }
  0xe0   : > { %v607_v30 = vmul.f32 0.35355338, %v1212_v28  ;;  %v609_v31 = vmul.f32 0.35355338, %v1219_v29 }
  0xe1   : > { %v506_v32 = vpop.f32.mrf.mxu0  ;;  %v593_v33 = vpop.f32.mrf.mxu1 }
  0xe2   : > { %v606_v34 = vmul.f32 0.35355338, %v506_v32  ;;  %v626_v35 = vsel %vm610_vm1, %v607_v30, -inf  ;;  %v608_v36 = vmul.f32 0.35355338, %v593_v33  ;;  %v632_v38 = vsel %vm610_vm1, %v609_v31, -inf }
  0xe3   : > { %627 = vmax.xlane.f32.xlu1 %v626_v35  ;;  %v249_v35 = vld [vmem:[%s1403_s24 + $0x20] sm:$0xff] }
  0xe4   : > { %v623_v37 = vsel %vm610_vm1, %v606_v34, -inf  ;;  %v629_v39 = vsel %vm610_vm1, %v608_v36, -inf }
  0xe5   : > { %624 = vmax.xlane.f32.xlu0 %v623_v37 }
  0xe7   : > { %633 = vmax.xlane.f32.xlu1 %v632_v38 }
  0xe9   : > { %630 = vmax.xlane.f32.xlu0 %v629_v39 }
 0x164   : > { %v622_v40 = vpop.xlane.xlu1 %621  ;;  %v616_v41 = vpop.xlane.xlu0 %615 }
 0x165   : > { %v638_v42 = vsub.f32 %v605_v19, %v622_v40  ;;  %v636_v43 = vsub.f32 %v603_v18, %v616_v41  ;;  %v248_v18 = vld [vmem:[%s1403_s24 + $0x18] sm:$0xff]  ;;  %v247_v19 = vld [vmem:[%s1403_s24 + $0x10] sm:$0xff] }
 0x166   : > { %1227 = vmatprep.subr.mxu1 %v248_v18  ;;  %v251_v40 = vld [vmem:[%s1403_s24 + $0x30] sm:$0xff] }
 0x167   : > { %v645_v44 = vmul.f32 1.442695, %v636_v43  ;;  %v649_v45 = vmul.f32 1.442695, %v638_v42  ;;  %1228 = vmatpush3.msra.mxu1 %v248_v18 }
 0x168   : > { %v619_v46 = vpop.xlane.xlu1 %618  ;;  %v613_v47 = vpop.xlane.xlu0 %612  ;;  %1229 = vmatprep.subr.mxu1 %v247_v19 }
 0x169   : > { %v637_v48 = vsub.f32 %v604_v24, %v619_v46  ;;  %v635_v49 = vsub.f32 %v602_v22, %v613_v47  ;;  %1256 = vpow2.f32 %v645_v44  ;;  %1230 = vmatpush3.msra.mxu1 %v247_v19 }
 0x16a   : > { %1258 = vpow2.f32 %v649_v45  ;;  %1241 = vmatprep.subr.mxu1 %v252_v21 }
 0x16b   : > { %v643_v50 = vmul.f32 1.442695, %v635_v49  ;;  %v647_v51 = vmul.f32 1.442695, %v637_v48 }
 0x16c   : > { %v628_v52 = vpop.xlane.xlu1 %627 }
 0x16d   : > { %v640_v53 = vsub.f32 %v607_v30, %v628_v52  ;;  %1260 = vpow2.f32 %v643_v50 }
 0x16e   : > { %v625_v54 = vpop.xlane.xlu0 %624  ;;  %1262 = vpow2.f32 %v647_v51 }
 0x16f   : > { %v653_v55 = vmul.f32 1.442695, %v640_v53  ;;  %v639_v56 = vsub.f32 %v606_v34, %v625_v54 }
 0x170   : > { %v634_v57 = vpop.xlane.xlu1 %633 }
 0x171   : > { %1264 = vpow2.f32 %v653_v55  ;;  %v651_v58 = vmul.f32 1.442695, %v639_v56  ;;  %v642_v59 = vsub.f32 %v609_v31, %v634_v57 }
 0x172   : > { %v631_v60 = vpop.xlane.xlu0 %630 }
 0x173   : > { %v657_v61 = vmul.f32 1.442695, %v642_v59  ;;  %v641_v62 = vsub.f32 %v608_v36, %v631_v60  ;;  %1266 = vpow2.f32 %v651_v58 }
 0x175   : > { %1268 = vpow2.f32 %v657_v61  ;;  %v655_v63 = vmul.f32 1.442695, %v641_v62 }
 0x176   : > { %v1257_v0 = vpop.eup %1256 }
 0x177   : > { %1270 = vpow2.f32 %v655_v63  ;;  %v662_v1 = vsel %vm610_vm1, %v1257_v0, 0.0  ;;  %v1377_v2 = vpop.eup %1258 }
 0x178   : > { %663 = vadd.xlane.f32.xlu1 %v662_v1  ;;  %v668_v4 = vsel %vm610_vm1, %v1377_v2, 0.0 }
 0x17a   : > { %v1261_v3 = vpop.eup %1260 }
 0x17b   : > { %v659_v5 = vsel %vm610_vm1, %v1261_v3, 0.0  ;;  %v1263_v6 = vpop.eup %1262 }
 0x17c   : > { %669 = vadd.xlane.f32.xlu1 %v668_v4  ;;  %660 = vadd.xlane.f32.xlu0 %v659_v5  ;;  %v665_v9 = vsel %vm610_vm1, %v1263_v6, 0.0 }
 0x17e   : > { %v1382_v7 = vpop.eup %1264 }
 0x17f   : > { %v674_v8 = vsel %vm610_vm1, %v1382_v7, 0.0 }
 0x180   : > { %v1387_v10 = vpop.eup %1266  ;;  %675 = vadd.xlane.f32.xlu1 %v674_v8  ;;  %666 = vadd.xlane.f32.xlu0 %v665_v9 }
 0x181   : > { %v671_v13 = vsel %vm610_vm1, %v1387_v10, 0.0 }
 0x182   : > { %v1389_v11 = vpop.eup %1268 }
 0x183   : > { %v680_v12 = vsel %vm610_vm1, %v1389_v11, 0.0 }
 0x184   : > { %v1395_v14 = vpop.eup %1270  ;;  %681 = vadd.xlane.f32.xlu1 %v680_v12  ;;  %672 = vadd.xlane.f32.xlu0 %v671_v13 }
 0x185   : > { %v677_v15 = vsel %vm610_vm1, %v1395_v14, 0.0 }
 0x188   : > { %678 = vadd.xlane.f32.xlu0 %v677_v15 }
 0x201   : > { %v664_v22 = vpop.xlane.xlu1 %663 }
 0x202   : > { %1272 = vrcp.f32 %v664_v22 }
 0x205   : > { %v670_v23 = vpop.xlane.xlu1 %669  ;;  %v661_v24 = vpop.xlane.xlu0 %660 }
 0x206   : > { %1274 = vrcp.f32 %v661_v24 }
 0x207   : > { %1276 = vrcp.f32 %v670_v23 }
 0x209   : > { %v676_v25 = vpop.xlane.xlu1 %675  ;;  %v667_v26 = vpop.xlane.xlu0 %666 }
 0x20a   : > { %1278 = vrcp.f32 %v667_v26 }
 0x20b   : > { %1280 = vrcp.f32 %v676_v25 }
 0x20d   : > { %v673_v27 = vpop.xlane.xlu0 %672  ;;  %v682_v28 = vpop.xlane.xlu1 %681 }
 0x20e   : > { %1282 = vrcp.f32 %v673_v27 }
 0x20f   : > { %1284 = vrcp.f32 %v682_v28  ;;  %v1273_v30 = vpop.eup %1272 }
 0x210   : > { %v686_v33 = vmul.f32 %v1273_v30, %v1257_v0 }
 0x211   : > { %v679_v29 = vpop.xlane.xlu0 %678 }
 0x212   : > { %1286 = vrcp.f32 %v679_v29 }
 0x213   : > { %v1275_v31 = vpop.eup %1274 }
 0x214   : > { %v684_v32 = vmul.f32 %v1275_v31, %v1261_v3  ;;  %v1277_v34 = vpop.eup %1276 }
 0x215   : > { %v690_v38 = vmul.f32 %v1277_v34, %v1377_v2 }
 0x216   : > { %1224 = vmatprep.mubr.msk.f32.mxu0 %vm610_vm1, %v684_v32 }
 0x217   : > { %v1279_v36 = vpop.eup %1278  ;;  %1225 = vmatmul.mubr.msk.f32.vlgmr.msra.gmra.mxu0 %vm610_vm1, %v686_v33 }
 0x218   : > { %v688_v37 = vmul.f32 %v1279_v36, %v1263_v6  ;;  %1235 = vmatpush3.msra.mxu0 %v250_v20  ;;  %v1281_v39 = vpop.eup %1280 }
 0x219   : > { %1236 = vmatprep.subr.mxu0 %v249_v35  ;;  %v694_v44 = vmul.f32 %v1281_v39, %v1382_v7 }
 0x21a   : > { %1231 = vmatprep.mubr.msk.f32.mxu1 %vm610_vm1, %v688_v37  ;;  %1237 = vmatpush3.msra.mxu0 %v249_v35 }
 0x21b   : > { %v1283_v41 = vpop.eup %1282  ;;  %1232 = vmatmul.mubr.msk.f32.vlgmr.msra.gmra.mxu1 %vm610_vm1, %v690_v38 }
 0x21c   : > { %v692_v42 = vmul.f32 %v1283_v41, %v1387_v10  ;;  %1242 = vmatpush3.msra.mxu1 %v252_v21  ;;  %v1285_v43 = vpop.eup %1284 }
 0x21d   : > { %1243 = vmatprep.subr.mxu1 %v251_v40  ;;  %v698_v47 = vmul.f32 %v1285_v43, %v1389_v11 }
 0x21e   : > { %1238 = vmatprep.mubr.msk.f32.mxu0 %vm610_vm1, %v692_v42  ;;  %1244 = vmatpush3.msra.mxu1 %v251_v40 }
 0x21f   : > { %v1287_v45 = vpop.eup %1286  ;;  %1239 = vmatmul.mubr.msk.f32.vlgmr.msra.gmra.mxu0 %vm610_vm1, %v694_v44 }
 0x220   : > { %v696_v46 = vmul.f32 %v1287_v45, %v1395_v14 }
 0x222   : > { %1245 = vmatprep.mubr.msk.f32.mxu1 %vm610_vm1, %v696_v46 }
 0x223   : > { %1246 = vmatmul.mubr.msk.f32.vlgmr.msra.gmra.mxu1 %vm610_vm1, %v698_v47 }
 0x2d7   : > { %v1226_v48 = vpop.f32.mrf.mxu0 }
 0x2d8   : > { %1024 = vst.msk [vmem:[%s227_s27 + $0x8] sm:$0xff] %vm253_vm0, %v1226_v48 }
 0x2d9   : > { %v771_v49 = vpop.f32.mrf.mxu0 }
 0x2da   : > { %1023 = vst.msk [vmem:[%s227_s27] sm:$0xff] %vm253_vm0, %v771_v49 }
 0x2db   : > { %v1233_v50 = vpop.f32.mrf.mxu1 }
 0x2dc   : > { %1026 = vst.msk [vmem:[%s227_s27 + $0x18] sm:$0xff] %vm253_vm0, %v1233_v50 }
 0x2dd   : > { %v852_v51 = vpop.f32.mrf.mxu1 }
 0x2de   : > { %1025 = vst.msk [vmem:[%s227_s27 + $0x10] sm:$0xff] %vm253_vm0, %v852_v51 }
 0x2df   : > { %v1240_v52 = vpop.f32.mrf.mxu0 }
 0x2e0   : > { %1028 = vst.msk [vmem:[%s227_s27 + $0x28] sm:$0xff] %vm253_vm0, %v1240_v52 }
 0x2e1   : > { %v933_v53 = vpop.f32.mrf.mxu0 }
 0x2e2   : > { %1027 = vst.msk [vmem:[%s227_s27 + $0x20] sm:$0xff] %vm253_vm0, %v933_v53 }
 0x2e3   : > { %v1247_v54 = vpop.f32.mrf.mxu1 }
 0x2e4   : > { %1030 = vst.msk [vmem:[%s227_s27 + $0x38] sm:$0xff] %vm253_vm0, %v1247_v54 }
 0x2e5   : > { %v1014_v55 = vpop.f32.mrf.mxu1 }
 0x2e6   : > { %1029 = vst.msk [vmem:[%s227_s27 + $0x30] sm:$0xff] %vm253_vm0, %v1014_v55 }
 0x2e7 PF: > { %s13_s12 = sadd.s32 1, %s1294_s12  }
 0x2e8   : > { %p10_p4 = scmp.ge.s32.totalorder %s13_s12, 4  }
 0x2ea   :  { %12 = sbr.rel (!%p10_p4) target bundleno = 1 (0x1), region = 68 }

// kernel: transformer_forward.19
= control target key start
LH: loop header
LB: loop body
LE: loop exit
PB: predicated region body
PF: predicated region fallthrough
CT: control target
= control target key end

     0   :  { %s326_s0 = inlined_call_operand.vmem [shape: f32[32,64], index: 0, kind: input, shape index: {}]   ;;  %s327_s1 = inlined_call_operand.vmem [shape: f32[64,32], index: 1, kind: input, shape index: {}]   ;;  %s328_s2 = inlined_call_operand.vmem [shape: f32[1,32], index: 2, kind: input, shape index: {}]   ;;  %s329_s3 = inlined_call_operand.vmem [shape: f32[32,32], index: 3, kind: input, shape index: {}]   ;;  %s330_s4 = inlined_call_operand.hbm [shape: f32[32,32], index: 4, kind: output, shape index: {}]  }
   0x1   :  { %v29_v0 = vld [vmem:[%s327_s1 + $0x38] sm:$0xff]  ;;  %v28_v1 = vld [vmem:[%s327_s1 + $0x30] sm:$0xff]  ;;  %v27_v2 = vld [vmem:[%s327_s1 + $0x28] sm:$0xff] }
   0x2   :  { %181 = vmatprep.subr.mxu0 %v29_v0  ;;  %203 = vmatprep.subr.mxu1 %v29_v0  ;;  %v26_v3 = vld [vmem:[%s327_s1 + $0x20] sm:$0xff] }
   0x3   :  { %182 = vmatpush3.msra.mxu0 %v29_v0  ;;  %211 = vmatpush3.msra.mxu1 %v29_v0 }
   0x4   :  { %183 = vmatprep.subr.mxu0 %v28_v1  ;;  %204 = vmatprep.subr.mxu1 %v28_v1 }
   0x5   :  { %184 = vmatpush3.msra.mxu0 %v28_v1  ;;  %212 = vmatpush3.msra.mxu1 %v28_v1 }
   0x6   :  { %9 = vsyncpa [#allocation3], 0  ;;  %185 = vmatprep.subr.mxu0 %v27_v2  ;;  %205 = vmatprep.subr.mxu1 %v27_v2  ;;  %v25_v4 = vld [vmem:[%s327_s1 + $0x18] sm:$0xff]  ;;  %v24_v5 = vld [vmem:[%s327_s1 + $0x10] sm:$0xff]  ;;  %vm37_vm0 = vcmask 523264   ;;  %vm143_vm1 = vcmask 261120  }
   0x7   :  { %186 = vmatpush3.msra.mxu0 %v27_v2  ;;  %213 = vmatpush3.msra.mxu1 %v27_v2  ;;  %v23_v6 = vld [vmem:[%s327_s1 + $0x8] sm:$0xff]  ;;  %v22_v7 = vld [vmem:[%s327_s1] sm:$0xff]  ;;  %v20_v9 = vld [vmem:[%s326_s0 + $0x10] sm:$0xff] }
   0x8   :  { %187 = vmatprep.subr.mxu0 %v26_v3  ;;  %206 = vmatprep.subr.mxu1 %v26_v3  ;;  %v18_v8 = vld [vmem:[%s326_s0] sm:$0xff]  ;;  %v19_v10 = vld [vmem:[%s326_s0 + $0x8] sm:$0xff]  ;;  %v21_v11 = vld [vmem:[%s326_s0 + $0x18] sm:$0xff]  ;;  %s244_s0 = smov [#allocation2]  }
   0x9   :  { %188 = vmatpush3.msra.mxu0 %v26_v3  ;;  %214 = vmatpush3.msra.mxu1 %v26_v3  ;;  %v164_v12 = vld [vmem:[%s328_s2] ss:$0 sm:$0xff]  ;;  %v136_v14 = vld [vmem:[%s329_s3 + $0x8] sm:$0xff]  ;;  %v138_v16 = vld [vmem:[%s329_s3 + $0x18] sm:$0xff]  ;;  %s153_s18 = sshll.u32 %s244_s0, 4  ;;  %s154_s18 = int_to_ptr.vmem [resolvable:$true] %s153_s18 }
   0xa   :  { %189 = vmatprep.subr.mxu0 %v25_v4  ;;  %207 = vmatprep.subr.mxu1 %v25_v4  ;;  %v135_v20 = vld [vmem:[%s329_s3] sm:$0xff]  ;;  %v137_v22 = vld [vmem:[%s329_s3 + $0x10] sm:$0xff]  ;;  %s222_s22 = scalar_lea.vmem %s154_s18, 512  ;;  %p227_p1 = scmp.lt.s32.totalorder %s154_s18, %s154_s18 }
   0xb   :  { %190 = vmatpush3.msra.mxu0 %v25_v4  ;;  %215 = vmatpush3.msra.mxu1 %v25_v4  ;;  %p223_p0 = scmp.ne.s32.totalorder %s154_s18, %s222_s22  ;;  %p228_p2 = scmp.lt.s32.totalorder %s222_s22, %s222_s22 }
   0xc   :  { %191 = vmatprep.subr.mxu0 %v24_v5  ;;  %208 = vmatprep.subr.mxu1 %v24_v5 }
   0xd   :  { %192 = vmatpush3.msra.mxu0 %v24_v5  ;;  %216 = vmatpush3.msra.mxu1 %v24_v5  ;;  %p229_p3 = por %p228_p2, %p227_p1 }
   0xe   :  { %193 = vmatprep.subr.mxu0 %v23_v6  ;;  %209 = vmatprep.subr.mxu1 %v23_v6 }
   0xf   :  { %194 = vmatpush3.msra.mxu0 %v23_v6  ;;  %217 = vmatpush3.msra.mxu1 %v23_v6  ;;  %p230_p4 = pnand %p229_p3, %p223_p0 }
  0x10   :  { %195 = vmatprep.subr.mxu0 %v22_v7  ;;  %210 = vmatprep.subr.mxu1 %v22_v7 }
  0x11   :  { %196 = vmatpush3.msra.mxu0 %v22_v7  ;;  %218 = vmatpush3.msra.mxu1 %v22_v7 }
  0x12   :  { %197 = vmatprep.mubr.msk.f32.mxu0 %vm37_vm0, %v18_v8  ;;  %200 = vmatprep.mubr.msk.f32.mxu1 %vm37_vm0, %v20_v9 }
  0x13   :  { %198 = vmatmul.mubr.msk.f32.vlgmr.msra.gmra.mxu0 %vm37_vm0, %v19_v10  ;;  %201 = vmatmul.mubr.msk.f32.vlgmr.msra.gmra.mxu1 %vm37_vm0, %v21_v11 }
  0xd3   :  { %v199_v13 = vpop.f32.mrf.mxu0  ;;  %v202_v15 = vpop.f32.mrf.mxu1 }
  0xd4   :  { %v122_v17 = vadd.f32 %v199_v13, %v164_v12  ;;  %v132_v18 = vadd.f32 %v202_v15, %v164_v12 }
  0xd5   :  { %v116_v19 = vpop.f32.mrf.mxu0  ;;  %v126_v21 = vpop.f32.mrf.mxu1 }
  0xd6   :  { %v140_v23 = vadd.f32 %v136_v14, %v122_v17  ;;  %v142_v24 = vadd.f32 %v138_v16, %v132_v18  ;;  %v117_v25 = vadd.f32 %v164_v12, %v116_v19  ;;  %v127_v26 = vadd.f32 %v164_v12, %v126_v21 }
  0xd8   :  { %145 = vst.msk [vmem:[#allocation2 + $0x8] sm:$0xff] %vm143_vm1, %v140_v23  ;;  %147 = vst.msk [vmem:[#allocation2 + $0x18] sm:$0xff] %vm143_vm1, %v142_v24  ;;  %v139_v27 = vadd.f32 %v135_v20, %v117_v25  ;;  %v141_v28 = vadd.f32 %v137_v22, %v127_v26 }
  0xda   :  { %144 = vst.msk [vmem:[#allocation2] sm:$0xff] %vm143_vm1, %v139_v27  ;;  %146 = vst.msk [vmem:[#allocation2 + $0x10] sm:$0xff] %vm143_vm1, %v141_v28 }
  0xdb   :  { %233 = shalt.err (!%p230_p4)
}
  0xdc   :  { %s245_s23 = smov 128   ;;  %s246_s3 = smov 8  }
  0xdd   :  { %159 = dma.vmem_to_hbm [thread:$0]  %s154_s18, 512, %s330_s4, [#allocation3], %s245_s23, %s245_s23, %s246_s3  }
  0xde   :  { %242 = dma.done.wait [#allocation3], 512  }
  0xdf   :  { %243 = vsyncadd [#allocation3], 4294966784 }
  0xe0   :  { %163 = vsyncpa [#allocation3], 1 }

// kernel: transformer_forward.15
= control target key start
LH: loop header
LB: loop body
LE: loop exit
PB: predicated region body
PF: predicated region fallthrough
CT: control target
= control target key end

     0   :  { %vm24_vm0 = vcmask 261120   ;;  %vm208_vm1 = vcmask 785408   ;;  %s359_s0 = inlined_call_operand.vmem [shape: f32[32,32], index: 0, kind: input, shape index: {}]   ;;  %s360_s3 = inlined_call_operand.vmem [shape: f32[32,96], index: 3, kind: input, shape index: {}]   ;;  %s361_s1 = inlined_call_operand.vmem [shape: f32[1,32], index: 1, kind: input, shape index: {}]   ;;  %s362_s2 = inlined_call_operand.vmem [shape: f32[1,32], index: 2, kind: input, shape index: {}]   ;;  %s363_s4 = inlined_call_operand.vmem [shape: f32[1,96], index: 4, kind: input, shape index: {}]   ;;  %s364_s5 = inlined_call_operand.vmem [shape: f32[32,96], index: 5, kind: output, shape index: {}]  }
   0x1   :  { %v20_v0 = vld [vmem:[%s359_s0] sm:$0xff]  ;;  %v21_v1 = vld [vmem:[%s359_s0 + $0x8] sm:$0xff]  ;;  %v22_v2 = vld [vmem:[%s359_s0 + $0x10] sm:$0xff] }
   0x2   :  { %v25_v3 = vsel %vm24_vm0, %v20_v0, 0.0  ;;  %v28_v4 = vsel %vm24_vm0, %v21_v1, 0.0  ;;  %v23_v5 = vld [vmem:[%s359_s0 + $0x18] sm:$0xff]  ;;  %v31_v6 = vsel %vm24_vm0, %v22_v2, 0.0  ;;  %v102_v29 = vld [vmem:[%s360_s3 + $0x10] sm:$0xff]  ;;  %v101_v30 = vld [vmem:[%s360_s3 + $0x8] sm:$0xff] }
   0x3   :  { %26 = vadd.xlane.f32.xlu0 %v25_v3  ;;  %29 = vadd.xlane.f32.xlu1 %v28_v4  ;;  %v34_v7 = vsel %vm24_vm0, %v23_v5, 0.0  ;;  %v103_v28 = vld [vmem:[%s360_s3 + $0x18] sm:$0xff]  ;;  %v100_v31 = vld [vmem:[%s360_s3] sm:$0xff] }
   0x4   :  { %232 = vmatprep.subr.mxu0 %v103_v28  ;;  %246 = vmatprep.subr.mxu1 %v103_v28  ;;  %v217_v45 = vld [vmem:[%s361_s1] ss:$0 sm:$0xff] }
   0x5   :  { %233 = vmatpush3.msra.mxu0 %v103_v28  ;;  %250 = vmatpush3.msra.mxu1 %v103_v28  ;;  %v218_v47 = vld [vmem:[%s362_s2] ss:$0 sm:$0xff] }
   0x6   :  { %234 = vmatprep.subr.mxu0 %v102_v29  ;;  %247 = vmatprep.subr.mxu1 %v102_v29  ;;  %v219_v62 = vld [vmem:[%s363_s4] ss:$0 sm:$0xff] }
   0x7   :  { %32 = vadd.xlane.f32.xlu0 %v31_v6  ;;  %35 = vadd.xlane.f32.xlu1 %v34_v7 }
   0x8   :  { %235 = vmatpush3.msra.mxu0 %v102_v29  ;;  %251 = vmatpush3.msra.mxu1 %v102_v29 }
   0x9   :  { %236 = vmatprep.subr.mxu0 %v101_v30  ;;  %248 = vmatprep.subr.mxu1 %v101_v30 }
   0xa   :  { %237 = vmatpush3.msra.mxu0 %v101_v30  ;;  %252 = vmatpush3.msra.mxu1 %v101_v30 }
   0xb   :  { %238 = vmatprep.subr.mxu0 %v100_v31  ;;  %249 = vmatprep.subr.mxu1 %v100_v31 }
   0xc   :  { %239 = vmatpush3.msra.mxu0 %v100_v31  ;;  %253 = vmatpush3.msra.mxu1 %v100_v31 }
  0x8c   :  { %v27_v8 = vpop.xlane.xlu0 %26  ;;  %v30_v9 = vpop.xlane.xlu1 %29 }
  0x8d   :  { %v38_v10 = vmul.f32 0.03125, %v27_v8  ;;  %v39_v11 = vmul.f32 0.03125, %v30_v9 }
  0x8f   :  { %v42_v12 = vsub.f32 %v20_v0, %v38_v10  ;;  %v308_v13 = vsub.f32 %v21_v1, %v39_v11 }
  0x90   :  { %v33_v14 = vpop.xlane.xlu0 %32  ;;  %v36_v15 = vpop.xlane.xlu1 %35 }
  0x91   :  { %v40_v16 = vmul.f32 0.03125, %v33_v14  ;;  %v41_v17 = vmul.f32 0.03125, %v36_v15  ;;  %v46_v18 = vmul.f32 %v42_v12, %v42_v12  ;;  %v47_v19 = vmul.f32 %v308_v13, %v308_v13 }
  0x93   :  { %v44_v20 = vsub.f32 %v22_v2, %v40_v16  ;;  %v312_v21 = vsub.f32 %v23_v5, %v41_v17  ;;  %v50_v22 = vsel %vm24_vm0, %v46_v18, 0.0  ;;  %v53_v23 = vsel %vm24_vm0, %v47_v19, 0.0 }
  0x94   :  { %51 = vadd.xlane.f32.xlu0 %v50_v22 }
  0x95   :  { %v48_v24 = vmul.f32 %v44_v20, %v44_v20  ;;  %v49_v25 = vmul.f32 %v312_v21, %v312_v21 }
  0x97   :  { %v56_v26 = vsel %vm24_vm0, %v48_v24, 0.0  ;;  %v59_v27 = vsel %vm24_vm0, %v49_v25, 0.0 }
  0x98   :  { %54 = vadd.xlane.f32.xlu0 %v53_v23  ;;  %57 = vadd.xlane.f32.xlu1 %v56_v26 }
  0x9c   :  { %60 = vadd.xlane.f32.xlu1 %v59_v27 }
 0x11d   :  { %v52_v32 = vpop.xlane.xlu0 %51 }
 0x11e   :  { %v62_v33 = vmul.f32 0.03125, %v52_v32 }
 0x120   :  { %v66_v34 = vadd.f32 1e-05, %v62_v33 }
 0x121   :  { %v58_v35 = vpop.xlane.xlu1 %57  ;;  %v55_v36 = vpop.xlane.xlu0 %54 }
 0x122   :  { %254 = vrsqrt.f32 %v66_v34  ;;  %v64_v37 = vmul.f32 0.03125, %v58_v35  ;;  %v63_v38 = vmul.f32 0.03125, %v55_v36 }
 0x124   :  { %v68_v39 = vadd.f32 1e-05, %v64_v37  ;;  %v67_v40 = vadd.f32 1e-05, %v63_v38 }
 0x125   :  { %v61_v41 = vpop.xlane.xlu1 %60 }
 0x126   :  { %256 = vrsqrt.f32 %v68_v39  ;;  %v65_v42 = vmul.f32 0.03125, %v61_v41 }
 0x127   :  { %258 = vrsqrt.f32 %v67_v40 }
 0x128   :  { %v69_v43 = vadd.f32 1e-05, %v65_v42 }
 0x12a   :  { %260 = vrsqrt.f32 %v69_v43 }
 0x12f   :  { %v255_v44 = vpop.eup %254 }
 0x130   :  { %v74_v46 = vmul.f32 %v255_v44, %v42_v12 }
 0x132   :  { %v85_v48 = vmul.f32 %v217_v45, %v74_v46 }
 0x133   :  { %v257_v49 = vpop.eup %256 }
 0x134   :  { %v259_v50 = vpop.eup %258  ;;  %v96_v51 = vadd.f32 %v218_v47, %v85_v48  ;;  %v76_v52 = vmul.f32 %v257_v49, %v44_v20 }
 0x135   :  { %v75_v53 = vmul.f32 %v259_v50, %v308_v13 }
 0x136   :  { %240 = vmatprep.mubr.msk.f32.mxu0 %vm24_vm0, %v96_v51  ;;  %v87_v54 = vmul.f32 %v217_v45, %v76_v52 }
 0x137   :  { %v261_v55 = vpop.eup %260  ;;  %v86_v56 = vmul.f32 %v217_v45, %v75_v53 }
 0x138   :  { %v98_v57 = vadd.f32 %v218_v47, %v87_v54  ;;  %v77_v58 = vmul.f32 %v261_v55, %v312_v21 }
 0x139   :  { %v97_v59 = vadd.f32 %v218_v47, %v86_v56 }
 0x13a   :  { %243 = vmatprep.mubr.msk.f32.mxu1 %vm24_vm0, %v98_v57  ;;  %v88_v60 = vmul.f32 %v217_v45, %v77_v58 }
 0x13b   :  { %241 = vmatmul.mubr.msk.f32.vlgmr.msra.gmra.mxu0 %vm24_vm0, %v97_v59 }
 0x13c   :  { %v99_v61 = vadd.f32 %v218_v47, %v88_v60 }
 0x13e   :  { %244 = vmatmul.mubr.msk.f32.vlgmr.msra.gmra.mxu1 %vm24_vm0, %v99_v61 }
 0x1fb   :  { %v242_v63 = vpop.f32.mrf.mxu0 }
 0x1fc   :  { %v195_v0 = vadd.f32 %v242_v63, %v219_v62 }
 0x1fd   :  { %v189_v1 = vpop.f32.mrf.mxu0 }
 0x1fe   :  { %210 = vst.msk [vmem:[%s364_s5 + $0x8] sm:$0xff] %vm208_vm1, %v195_v0  ;;  %v190_v2 = vadd.f32 %v219_v62, %v189_v1  ;;  %v245_v3 = vpop.f32.mrf.mxu1 }
 0x1ff   :  { %v205_v4 = vadd.f32 %v245_v3, %v219_v62 }
 0x200   :  { %209 = vst.msk [vmem:[%s364_s5] sm:$0xff] %vm208_vm1, %v190_v2  ;;  %v199_v5 = vpop.f32.mrf.mxu1 }
 0x201   :  { %212 = vst.msk [vmem:[%s364_s5 + $0x18] sm:$0xff] %vm208_vm1, %v205_v4  ;;  %v200_v6 = vadd.f32 %v219_v62, %v199_v5 }
 0x203   :  { %211 = vst.msk [vmem:[%s364_s5 + $0x10] sm:$0xff] %vm208_vm1, %v200_v6 }

// kernel: transformer_forward.14
= control target key start
LH: loop header
LB: loop body
LE: loop exit
PB: predicated region body
PF: predicated region fallthrough
CT: control target
= control target key end

     0   :  { %vm36_vm0 = vcmask 523264   ;;  %vm142_vm1 = vcmask 261120   ;;  %s294_s1 = inlined_call_operand.vmem [shape: f32[64,32], index: 1, kind: input, shape index: {}]   ;;  %s295_s0 = inlined_call_operand.vmem [shape: f32[32,64], index: 0, kind: input, shape index: {}]   ;;  %s296_s2 = inlined_call_operand.vmem [shape: f32[1,32], index: 2, kind: input, shape index: {}]   ;;  %s297_s3 = inlined_call_operand.vmem [shape: f32[32,32], index: 3, kind: input, shape index: {}]   ;;  %s298_s4 = inlined_call_operand.vmem [shape: f32[32,32], index: 4, kind: output, shape index: {}]  }
   0x1   :  { %v28_v0 = vld [vmem:[%s294_s1 + $0x38] sm:$0xff]  ;;  %v27_v1 = vld [vmem:[%s294_s1 + $0x30] sm:$0xff]  ;;  %v26_v2 = vld [vmem:[%s294_s1 + $0x28] sm:$0xff] }
   0x2   :  { %168 = vmatprep.subr.mxu0 %v28_v0  ;;  %190 = vmatprep.subr.mxu1 %v28_v0  ;;  %v25_v3 = vld [vmem:[%s294_s1 + $0x20] sm:$0xff]  ;;  %v24_v4 = vld [vmem:[%s294_s1 + $0x18] sm:$0xff]  ;;  %v23_v5 = vld [vmem:[%s294_s1 + $0x10] sm:$0xff] }
   0x3   :  { %169 = vmatpush3.msra.mxu0 %v28_v0  ;;  %198 = vmatpush3.msra.mxu1 %v28_v0  ;;  %v22_v6 = vld [vmem:[%s294_s1 + $0x8] sm:$0xff]  ;;  %v21_v7 = vld [vmem:[%s294_s1] sm:$0xff]  ;;  %v19_v9 = vld [vmem:[%s295_s0 + $0x10] sm:$0xff] }
   0x4   :  { %170 = vmatprep.subr.mxu0 %v27_v1  ;;  %191 = vmatprep.subr.mxu1 %v27_v1  ;;  %v17_v8 = vld [vmem:[%s295_s0] sm:$0xff]  ;;  %v18_v10 = vld [vmem:[%s295_s0 + $0x8] sm:$0xff]  ;;  %v20_v11 = vld [vmem:[%s295_s0 + $0x18] sm:$0xff] }
   0x5   :  { %171 = vmatpush3.msra.mxu0 %v27_v1  ;;  %199 = vmatpush3.msra.mxu1 %v27_v1  ;;  %v151_v12 = vld [vmem:[%s296_s2] ss:$0 sm:$0xff]  ;;  %v135_v14 = vld [vmem:[%s297_s3 + $0x8] sm:$0xff]  ;;  %v137_v16 = vld [vmem:[%s297_s3 + $0x18] sm:$0xff] }
   0x6   :  { %172 = vmatprep.subr.mxu0 %v26_v2  ;;  %192 = vmatprep.subr.mxu1 %v26_v2  ;;  %v134_v20 = vld [vmem:[%s297_s3] sm:$0xff]  ;;  %v136_v22 = vld [vmem:[%s297_s3 + $0x10] sm:$0xff] }
   0x7   :  { %173 = vmatpush3.msra.mxu0 %v26_v2  ;;  %200 = vmatpush3.msra.mxu1 %v26_v2 }
   0x8   :  { %174 = vmatprep.subr.mxu0 %v25_v3  ;;  %193 = vmatprep.subr.mxu1 %v25_v3 }
   0x9   :  { %175 = vmatpush3.msra.mxu0 %v25_v3  ;;  %201 = vmatpush3.msra.mxu1 %v25_v3 }
   0xa   :  { %176 = vmatprep.subr.mxu0 %v24_v4  ;;  %194 = vmatprep.subr.mxu1 %v24_v4 }
   0xb   :  { %177 = vmatpush3.msra.mxu0 %v24_v4  ;;  %202 = vmatpush3.msra.mxu1 %v24_v4 }
   0xc   :  { %178 = vmatprep.subr.mxu0 %v23_v5  ;;  %195 = vmatprep.subr.mxu1 %v23_v5 }
   0xd   :  { %179 = vmatpush3.msra.mxu0 %v23_v5  ;;  %203 = vmatpush3.msra.mxu1 %v23_v5 }
   0xe   :  { %180 = vmatprep.subr.mxu0 %v22_v6  ;;  %196 = vmatprep.subr.mxu1 %v22_v6 }
   0xf   :  { %181 = vmatpush3.msra.mxu0 %v22_v6  ;;  %204 = vmatpush3.msra.mxu1 %v22_v6 }
  0x10   :  { %182 = vmatprep.subr.mxu0 %v21_v7  ;;  %197 = vmatprep.subr.mxu1 %v21_v7 }
  0x11   :  { %183 = vmatpush3.msra.mxu0 %v21_v7  ;;  %205 = vmatpush3.msra.mxu1 %v21_v7 }
  0x12   :  { %184 = vmatprep.mubr.msk.f32.mxu0 %vm36_vm0, %v17_v8  ;;  %187 = vmatprep.mubr.msk.f32.mxu1 %vm36_vm0, %v19_v9 }
  0x13   :  { %185 = vmatmul.mubr.msk.f32.vlgmr.msra.gmra.mxu0 %vm36_vm0, %v18_v10  ;;  %188 = vmatmul.mubr.msk.f32.vlgmr.msra.gmra.mxu1 %vm36_vm0, %v20_v11 }
  0xd3   :  { %v186_v13 = vpop.f32.mrf.mxu0  ;;  %v189_v15 = vpop.f32.mrf.mxu1 }
  0xd4   :  { %v121_v17 = vadd.f32 %v186_v13, %v151_v12  ;;  %v131_v18 = vadd.f32 %v189_v15, %v151_v12 }
  0xd5   :  { %v115_v19 = vpop.f32.mrf.mxu0  ;;  %v125_v21 = vpop.f32.mrf.mxu1 }
  0xd6   :  { %v139_v23 = vadd.f32 %v135_v14, %v121_v17  ;;  %v141_v24 = vadd.f32 %v137_v16, %v131_v18  ;;  %v116_v25 = vadd.f32 %v151_v12, %v115_v19  ;;  %v126_v26 = vadd.f32 %v151_v12, %v125_v21 }
  0xd8   :  { %144 = vst.msk [vmem:[%s298_s4 + $0x8] sm:$0xff] %vm142_vm1, %v139_v23  ;;  %146 = vst.msk [vmem:[%s298_s4 + $0x18] sm:$0xff] %vm142_vm1, %v141_v24  ;;  %v138_v27 = vadd.f32 %v134_v20, %v116_v25  ;;  %v140_v28 = vadd.f32 %v136_v22, %v126_v26 }
  0xda   :  { %143 = vst.msk [vmem:[%s298_s4] sm:$0xff] %vm142_vm1, %v138_v27  ;;  %145 = vst.msk [vmem:[%s298_s4 + $0x10] sm:$0xff] %vm142_vm1, %v140_v28 }

</bundles_post_ra>
